<compile_context>
chip_gen: v7x
topology: tpu7x:2x2x1
jax: 0.10.0
libtpu: 0.0.40
codegen_flags: <defaults>
</compile_context>

<pallas_src>
import functools

import jax
import jax.numpy as jnp
from jax.experimental import pallas as pl
from jax.experimental.pallas import tpu as pltpu

FILTER_SIZES = (2, 3, 4)
NUM_FILTERS = 64
HIDDEN = 768          # fixed by the module (conv kernel width == 768)
NUM_CLASS = 4


def _cnn_head_kernel(h_ref, wcat_ref, bcat_ref, wl_ref, bl_ref, out_ref, *,
                     block_b, seq, num_filters, filter_sizes):
    """One batch block: fused conv(k=2,3,4) -> ReLU -> time-max -> concat -> linear.

    h_ref    : (block_b*seq, H)      bf16  hidden states (batch-major, flattened)
    wcat_ref : (H, sum(k)*F)         bf16  all conv taps concatenated along lanes
    bcat_ref : (1, 3F)               f32   conv biases (filter_sizes order)
    wl_ref   : (3F, C)               f32   final linear weight (transposed)
    bl_ref   : (1, C)                f32   final linear bias
    out_ref  : (block_b, C)          f32   logits
    """
    # Single lane-dense MXU call: (Bt*S, 768) @ (768, 576) -> f32 accumulate.
    p = jnp.dot(h_ref[...], wcat_ref[...], preferred_element_type=jnp.float32)
    p3 = p.reshape(block_b, seq, p.shape[-1])     # (Bt, S, 9*F), rows are batch-major

    pooled = []
    col = 0
    for k in filter_sizes:
        L = seq - k + 1                           # valid conv output length
        # k-shift applied on the small post-matmul activations, PER SEQUENCE
        # (no leakage across batch boundaries), not on the 768-wide input.
        acc = p3[:, 0:L, col:col + num_filters]
        for j in range(1, k):                     # static unroll (k is tiny)
            acc = acc + p3[:, j:j + L,
                           col + j * num_filters:col + (j + 1) * num_filters]
        pooled.append(jnp.max(acc, axis=1))       # max_pool1d over time -> (Bt, F)
        col += k * num_filters

    feat = jnp.concatenate(pooled, axis=1)        # (Bt, 3F)
    # time-max / +bias / ReLU commute, so bias+ReLU only touch (Bt, 3F).
    feat = jnp.maximum(feat + bcat_ref[...], 0.0)
    # Dropout(p=0.1) is identity at inference time.
    logits = jnp.dot(feat, wl_ref[...], preferred_element_type=jnp.float32) + bl_ref[...]
    out_ref[...] = logits.astype(out_ref.dtype)


def _choose_block_b(batch, seq, hidden, vmem_budget_bytes=16 << 20):
    """Pick batch-block so the double-buffered bf16 hidden block + f32 product fit."""
    per_b = 2 * seq * hidden * 2 + seq * sum(FILTER_SIZES) * NUM_FILTERS * 4
    bt = max(1, min(batch, vmem_budget_bytes // per_b))
    while batch % bt:                             # keep the grid exact
        bt -= 1
    return int(bt)


def bert_cnn_head(hidden, params, block_b=None):
    """hidden: (B, S, H) float -> logits (B, C); CNN head runs in one Pallas kernel."""
    B, S, H = hidden.shape
    F = NUM_FILTERS
    C = params["bl"].shape[-1]
    if block_b is None:
        block_b = _choose_block_b(B, S, H)
    num_blocks = B // block_b

    # Fuse all conv taps into one lane-dense (H, 576) weight; bf16 matmul operands.
    wcat = jnp.concatenate(
        [params[f"w{k}"][j] for k in FILTER_SIZES for j in range(k)], axis=1
    ).astype(jnp.bfloat16)                                              # (768, 576)
    bcat = jnp.concatenate([params[f"b{k}"] for k in FILTER_SIZES], axis=1)  # (1, 3F)

    h2 = hidden.astype(jnp.bfloat16).reshape(B * S, H)                  # batch-major rows

    kernel = functools.partial(
        _cnn_head_kernel, block_b=block_b, seq=S,
        num_filters=F, filter_sizes=FILTER_SIZES)

    ncols = sum(FILTER_SIZES) * F
    vmem_est = (2 * 2 * block_b * S * H            # double-buffered bf16 hidden block
                + H * ncols * 2                    # resident fused conv weight
                + 4 * block_b * S * ncols          # in-kernel f32 product
                + (2 << 20))                       # headroom
    vmem_limit = int(min(max(vmem_est, 8 << 20), 48 << 20))   # safe under v7x 64 MiB

    return pl.pallas_call(
        kernel,
        out_shape=jax.ShapeDtypeStruct((B, C), jnp.float32),
        grid=(num_blocks,),
        in_specs=[
            pl.BlockSpec((block_b * S, H), lambda b: (b, 0)),
            pl.BlockSpec(wcat.shape, lambda b: (0, 0)),
            pl.BlockSpec(bcat.shape, lambda b: (0, 0)),
            pl.BlockSpec(params["wl"].shape, lambda b: (0, 0)),
            pl.BlockSpec(params["bl"].shape, lambda b: (0, 0)),
        ],
        out_specs=pl.BlockSpec((block_b, C), lambda b: (b, 0)),
        compiler_params=pltpu.CompilerParams(
            dimension_semantics=("parallel",),
            vmem_limit_bytes=vmem_limit),
    )(h2, wcat, bcat, params["wl"], params["bl"])


def surrogate_bert_encoder(input_id, mask, emb_table, pos_table):
    """Deterministic stand-in for the pretrained BERT encoder (plain JAX glue)."""
    h = emb_table[input_id] + pos_table[None, : input_id.shape[1], :]
    return h * mask[..., None].astype(h.dtype)


def reference_head(hidden, params):
    """Pure-JAX reference for the CNN head (bf16-rounded operands, f32 math)."""
    h = hidden.astype(jnp.bfloat16).astype(jnp.float32)
    feats = []
    for k in FILTER_SIZES:
        w = params[f"w{k}"].astype(jnp.bfloat16).astype(jnp.float32)    # (k, H, F)
        L = h.shape[1] - k + 1
        acc = sum(jnp.einsum("bsh,hf->bsf", h[:, j:j + L], w[j]) for j in range(k))
        acc = jnp.maximum(acc + params[f"b{k}"][None], 0.0)
        feats.append(jnp.max(acc, axis=1))
    feat = jnp.concatenate(feats, axis=1)
    return feat @ params["wl"] + params["bl"]


def init_params(key, num_filters=NUM_FILTERS, filter_sizes=FILTER_SIZES,
                hidden=HIDDEN, num_class=NUM_CLASS, vocab=128, max_seq=64):
    keys = jax.random.split(key, 2 * len(filter_sizes) + 4)
    params = {}
    ki = 0
    for k in filter_sizes:
        # torch Conv2d weight (F, 1, k, H)  ->  stored here as (k, H, F)
        params[f"w{k}"] = jax.random.normal(
            keys[ki], (k, hidden, num_filters), jnp.float32) * 0.02
        ki += 1
        params[f"b{k}"] = jax.random.normal(
            keys[ki], (1, num_filters), jnp.float32) * 0.02
        ki += 1
    d_in = num_filters * len(filter_sizes)
    # torch Linear weight (C, 3F) -> stored transposed as (3F, C)
    params["wl"] = jax.random.normal(keys[ki], (d_in, num_class), jnp.float32) * 0.02
    ki += 1
    params["bl"] = jax.random.normal(keys[ki], (1, num_class), jnp.float32) * 0.02
    ki += 1
    params["emb"] = jax.random.normal(keys[ki], (vocab, hidden), jnp.float32) * 0.02
    ki += 1
    params["pos"] = jax.random.normal(keys[ki], (max_seq, hidden), jnp.float32) * 0.02
    return params


def forward(input_id, mask, params):
    hidden = surrogate_bert_encoder(input_id, mask, params["emb"], params["pos"])
    return bert_cnn_head(hidden.astype(jnp.float32), params)


if __name__ == "__main__":
    B, S = 2, 16
    key = jax.random.PRNGKey(0)
    k_param, k_ids = jax.random.split(key)

    params = init_params(k_param)
    input_id = jax.random.randint(k_ids, (B, S), 0, 128, dtype=jnp.int32)
    mask = jnp.ones((B, S), dtype=jnp.int32).at[:, -2:].set(0)   # last 2 tokens padded

    hidden = surrogate_bert_encoder(input_id, mask, params["emb"], params["pos"])
    logits = bert_cnn_head(hidden.astype(jnp.float32), params)
    jax.block_until_ready(logits)

    ref = reference_head(hidden.astype(jnp.float32), params)
    assert logits.shape == (B, NUM_CLASS)
    assert jnp.allclose(logits, ref, rtol=1e-2, atol=1e-2)
    print("KERNEL_OK")
</pallas_src>

<mosaic_0001>
module attributes {stable_mosaic.version = 11 : i64} {
  func.func @_cnn_head_kernel(%arg0: i32, %arg1: memref<32x768xbf16, #tpu.memory_space<vmem>>, %arg2: memref<768x576xbf16, #tpu.memory_space<vmem>>, %arg3: memref<1x192xf32, #tpu.memory_space<vmem>>, %arg4: memref<192x4xf32, #tpu.memory_space<vmem>>, %arg5: memref<1x4xf32, #tpu.memory_space<vmem>>, %arg6: memref<2x4xf32, #tpu.memory_space<vmem>>) attributes {dimension_semantics = [#tpu.dimension_semantics<parallel>], iteration_bounds = array<i64: 1>, scalar_prefetch = 0 : i64, scratch_operands = 0 : i64, tpu.core_type = #tpu.core_type<tc>, window_params = [{transform_indices = @transform_0, window_bounds = array<i64: 32, 768>}, {pipeline_mode = #tpu.pipeline_mode<synchronous>, transform_indices = @transform_1, window_bounds = array<i64: 768, 576>}, {pipeline_mode = #tpu.pipeline_mode<synchronous>, transform_indices = @transform_2, window_bounds = array<i64: 1, 192>}, {pipeline_mode = #tpu.pipeline_mode<synchronous>, transform_indices = @transform_3, window_bounds = array<i64: 192, 4>}, {pipeline_mode = #tpu.pipeline_mode<synchronous>, transform_indices = @transform_4, window_bounds = array<i64: 1, 4>}, {transform_indices = @transform_5, window_bounds = array<i64: 2, 4>}]} {
    %c0 = arith.constant 0 : index
    %c0_0 = arith.constant 0 : index
    %0 = vector.load %arg1[%c0, %c0_0] : memref<32x768xbf16, #tpu.memory_space<vmem>>, vector<32x768xbf16>
    %c0_1 = arith.constant 0 : index
    %c0_2 = arith.constant 0 : index
    %1 = vector.load %arg2[%c0_1, %c0_2] : memref<768x576xbf16, #tpu.memory_space<vmem>>, vector<768x576xbf16>
    %cst = arith.constant dense<0.000000e+00> : vector<32x576xf32>
    %2 = tpu.matmul %0, %1, %cst {dimension_numbers = #tpu.dot_dimension_numbers<[1], [0], [0], [1], [0, 0, 1, 1], [], []>} : vector<32x768xbf16>, vector<768x576xbf16>, vector<32x576xf32> -> vector<32x576xf32>
    %3 = vector.shape_cast %2 : vector<32x576xf32> to vector<2x16x576xf32>
    %4 = vector.extract_strided_slice %3 {offsets = [0, 0, 0], sizes = [2, 15, 64], strides = [1, 1, 1]} : vector<2x16x576xf32> to vector<2x15x64xf32>
    %5 = vector.extract_strided_slice %3 {offsets = [0, 1, 64], sizes = [2, 15, 64], strides = [1, 1, 1]} : vector<2x16x576xf32> to vector<2x15x64xf32>
    %6 = arith.addf %4, %5 : vector<2x15x64xf32>
    %cst_3 = arith.constant dense<0xFF800000> : vector<2x64xf32>
    %7 = vector.multi_reduction <maximumf>, %6, %cst_3 [1] : vector<2x15x64xf32> to vector<2x64xf32>
    %8 = vector.extract_strided_slice %3 {offsets = [0, 0, 128], sizes = [2, 14, 64], strides = [1, 1, 1]} : vector<2x16x576xf32> to vector<2x14x64xf32>
    %9 = vector.extract_strided_slice %3 {offsets = [0, 1, 192], sizes = [2, 14, 64], strides = [1, 1, 1]} : vector<2x16x576xf32> to vector<2x14x64xf32>
    %10 = arith.addf %8, %9 : vector<2x14x64xf32>
    %11 = vector.extract_strided_slice %3 {offsets = [0, 2, 256], sizes = [2, 14, 64], strides = [1, 1, 1]} : vector<2x16x576xf32> to vector<2x14x64xf32>
    %12 = arith.addf %10, %11 : vector<2x14x64xf32>
    %cst_4 = arith.constant dense<0xFF800000> : vector<2x64xf32>
    %13 = vector.multi_reduction <maximumf>, %12, %cst_4 [1] : vector<2x14x64xf32> to vector<2x64xf32>
    %14 = vector.extract_strided_slice %3 {offsets = [0, 0, 320], sizes = [2, 13, 64], strides = [1, 1, 1]} : vector<2x16x576xf32> to vector<2x13x64xf32>
    %15 = vector.extract_strided_slice %3 {offsets = [0, 1, 384], sizes = [2, 13, 64], strides = [1, 1, 1]} : vector<2x16x576xf32> to vector<2x13x64xf32>
    %16 = arith.addf %14, %15 : vector<2x13x64xf32>
    %17 = vector.extract_strided_slice %3 {offsets = [0, 2, 448], sizes = [2, 13, 64], strides = [1, 1, 1]} : vector<2x16x576xf32> to vector<2x13x64xf32>
    %18 = arith.addf %16, %17 : vector<2x13x64xf32>
    %19 = vector.extract_strided_slice %3 {offsets = [0, 3, 512], sizes = [2, 13, 64], strides = [1, 1, 1]} : vector<2x16x576xf32> to vector<2x13x64xf32>
    %20 = arith.addf %18, %19 : vector<2x13x64xf32>
    %cst_5 = arith.constant dense<0xFF800000> : vector<2x64xf32>
    %21 = vector.multi_reduction <maximumf>, %20, %cst_5 [1] : vector<2x13x64xf32> to vector<2x64xf32>
    %22 = tpu.concatenate %7, %13, %21 in 1 : vector<2x64xf32>, vector<2x64xf32>, vector<2x64xf32> -> vector<2x192xf32>
    %c0_6 = arith.constant 0 : index
    %c0_7 = arith.constant 0 : index
    %23 = vector.load %arg3[%c0_6, %c0_7] : memref<1x192xf32, #tpu.memory_space<vmem>>, vector<1x192xf32>
    %24 = vector.broadcast %23 : vector<1x192xf32> to vector<2x192xf32>
    %25 = arith.addf %22, %24 : vector<2x192xf32>
    %cst_8 = arith.constant 0.000000e+00 : f32
    %26 = vector.broadcast %cst_8 : f32 to vector<2x192xf32>
    %27 = arith.maximumf %25, %26 : vector<2x192xf32>
    %c0_9 = arith.constant 0 : index
    %c0_10 = arith.constant 0 : index
    %28 = vector.load %arg4[%c0_9, %c0_10] : memref<192x4xf32, #tpu.memory_space<vmem>>, vector<192x4xf32>
    %cst_11 = arith.constant dense<0.000000e+00> : vector<2x4xf32>
    %29 = tpu.matmul %27, %28, %cst_11 {dimension_numbers = #tpu.dot_dimension_numbers<[1], [0], [0], [1], [0, 0, 1, 1], [], []>} : vector<2x192xf32>, vector<192x4xf32>, vector<2x4xf32> -> vector<2x4xf32>
    %c0_12 = arith.constant 0 : index
    %c0_13 = arith.constant 0 : index
    %30 = vector.load %arg5[%c0_12, %c0_13] : memref<1x4xf32, #tpu.memory_space<vmem>>, vector<1x4xf32>
    %31 = vector.broadcast %30 : vector<1x4xf32> to vector<2x4xf32>
    %32 = arith.addf %29, %31 : vector<2x4xf32>
    %c0_14 = arith.constant 0 : index
    %c0_15 = arith.constant 0 : index
    %33 = vector.load %arg6[%c0_14, %c0_15] : memref<2x4xf32, #tpu.memory_space<vmem>>, vector<2x4xf32>
    tpu.vector_store %arg6[%c0_14, %c0_15], %32 {strides = array<i32>} : memref<2x4xf32, #tpu.memory_space<vmem>>, vector<2x4xf32>,
    return
  }
  func.func @transform_0(%arg0: i32) -> (i32, i32) {
    %c0_i32 = arith.constant 0 : i32
    %c0_i32_0 = arith.constant 0 : i32
    return %arg0, %c0_i32 : i32, i32
  }
  func.func @transform_1(%arg0: i32) -> (i32, i32) {
    %c0_i32 = arith.constant 0 : i32
    %c0_i32_0 = arith.constant 0 : i32
    %c0_i32_1 = arith.constant 0 : i32
    return %c0_i32, %c0_i32_0 : i32, i32
  }
  func.func @transform_2(%arg0: i32) -> (i32, i32) {
    %c0_i32 = arith.constant 0 : i32
    %c0_i32_0 = arith.constant 0 : i32
    %c0_i32_1 = arith.constant 0 : i32
    return %c0_i32, %c0_i32_0 : i32, i32
  }
  func.func @transform_3(%arg0: i32) -> (i32, i32) {
    %c0_i32 = arith.constant 0 : i32
    %c0_i32_0 = arith.constant 0 : i32
    %c0_i32_1 = arith.constant 0 : i32
    return %c0_i32, %c0_i32_0 : i32, i32
  }
  func.func @transform_4(%arg0: i32) -> (i32, i32) {
    %c0_i32 = arith.constant 0 : i32
    %c0_i32_0 = arith.constant 0 : i32
    %c0_i32_1 = arith.constant 0 : i32
    return %c0_i32, %c0_i32_0 : i32, i32
  }
  func.func @transform_5(%arg0: i32) -> (i32, i32) {
    %c0_i32 = arith.constant 0 : i32
    %c0_i32_0 = arith.constant 0 : i32
    return %arg0, %c0_i32 : i32, i32
  }
}

</mosaic_0001>

<bundles_post_ra>
// kernel: tpu_custom_call.1
= control target key start
LH: loop header
LB: loop body
LE: loop exit
PB: predicated region body
PF: predicated region fallthrough
CT: control target
= control target key end

     0   :  { %s4322_s0 = inlined_call_operand.vmem [shape: bf16[32,768], index: 0, kind: input, shape index: {}]   ;;  %s4323_s1 = inlined_call_operand.vmem [shape: bf16[768,576], index: 1, kind: input, shape index: {}]   ;;  %s4324_s2 = inlined_call_operand.vmem [shape: f32[1,192], index: 2, kind: input, shape index: {}]   ;;  %s4325_s3 = inlined_call_operand.vmem [shape: f32[192,4], index: 3, kind: input, shape index: {}]   ;;  %s4326_s4 = inlined_call_operand.vmem [shape: f32[1,4], index: 4, kind: input, shape index: {}]   ;;  %s4327_s5 = inlined_call_operand.hbm [shape: f32[2,4], index: 5, kind: output, shape index: {}]  }
   0x1   :  { %v2856_v0 = vld [vmem:[%s4323_s1 + $0x4] ss:$20 sps:$4 sm:$0xff]   ;;  %v2858_v1 = vld [vmem:[%s4323_s1 + $0xc] ss:$20 sps:$4 sm:$0xff]   ;;  %v2861_v3 = vld [vmem:[%s4323_s1 + $0x8] ss:$20 sps:$4 sm:$0xff]  }
   0x2   :  { %1630 = vmatprep.subr.bf16.mxu0 %v2856_v0  ;;  %v2860_v2 = vld [vmem:[%s4323_s1] ss:$20 sps:$4 sm:$0xff]   ;;  %1789 = vmatprep.subr.bf16.mxu1 %v2858_v1  ;;  %v2866_v6 = vld [vmem:[%s4323_s1 + $0x28] ss:$20 sps:$4 sm:$0xff]   ;;  %v2867_v7 = vld [vmem:[%s4323_s1 + $0x30] ss:$20 sps:$4 sm:$0xff]  }
   0x3   :  { %v2862_v4 = vld [vmem:[%s4323_s1 + $0x2c] ss:$20 sps:$4 sm:$0xff]   ;;  %1631 = vmatpush1.bf16.msra.mxu0 %v2860_v2  ;;  %1790 = vmatpush1.bf16.msra.mxu1 %v2861_v3  ;;  %v2864_v5 = vld [vmem:[%s4323_s1 + $0x34] ss:$20 sps:$4 sm:$0xff]   ;;  %v2870_v9 = vld [vmem:[%s4323_s1 + $0x5c] ss:$20 sps:$4 sm:$0xff]  }
   0x4   :  { %1632 = vmatprep.subr.bf16.mxu0 %v2862_v4  ;;  %1791 = vmatprep.subr.bf16.mxu1 %v2864_v5  ;;  %v2868_v8 = vld [vmem:[%s4323_s1 + $0x54] ss:$20 sps:$4 sm:$0xff]   ;;  %v2872_v10 = vld [vmem:[%s4323_s1 + $0x50] ss:$20 sps:$4 sm:$0xff]   ;;  %v2873_v11 = vld [vmem:[%s4323_s1 + $0x58] ss:$20 sps:$4 sm:$0xff]  }
   0x5   :  { %v2874_v12 = vld [vmem:[%s4323_s1 + $0x7c] ss:$20 sps:$4 sm:$0xff]   ;;  %v2876_v13 = vld [vmem:[%s4323_s1 + $0x84] ss:$20 sps:$4 sm:$0xff]   ;;  %v2879_v15 = vld [vmem:[%s4323_s1 + $0x80] ss:$20 sps:$4 sm:$0xff]  }
   0x6   :  { %v2878_v14 = vld [vmem:[%s4323_s1 + $0x78] ss:$20 sps:$4 sm:$0xff]   ;;  %v2884_v18 = vld [vmem:[%s4323_s1 + $0xa0] ss:$20 sps:$4 sm:$0xff]   ;;  %v2885_v19 = vld [vmem:[%s4323_s1 + $0xa8] ss:$20 sps:$4 sm:$0xff]  }
   0x7   :  { %1633 = vmatpush1.bf16.msra.mxu0 %v2866_v6  ;;  %1792 = vmatpush1.bf16.msra.mxu1 %v2867_v7  ;;  %v2880_v16 = vld [vmem:[%s4323_s1 + $0xa4] ss:$20 sps:$4 sm:$0xff]   ;;  %v2882_v17 = vld [vmem:[%s4323_s1 + $0xac] ss:$20 sps:$4 sm:$0xff]   ;;  %v2888_v21 = vld [vmem:[%s4323_s1 + $0xd4] ss:$20 sps:$4 sm:$0xff]  }
   0x8   :  { %1634 = vmatprep.subr.bf16.mxu0 %v2868_v8  ;;  %1793 = vmatprep.subr.bf16.mxu1 %v2870_v9  ;;  %v2886_v20 = vld [vmem:[%s4323_s1 + $0xcc] ss:$20 sps:$4 sm:$0xff]   ;;  %v2890_v22 = vld [vmem:[%s4323_s1 + $0xc8] ss:$20 sps:$4 sm:$0xff]   ;;  %v2891_v23 = vld [vmem:[%s4323_s1 + $0xd0] ss:$20 sps:$4 sm:$0xff]  }
   0x9   :  { %v2892_v24 = vld [vmem:[%s4323_s1 + $0xf4] ss:$20 sps:$4 sm:$0xff]   ;;  %v2894_v25 = vld [vmem:[%s4323_s1 + $0xfc] ss:$20 sps:$4 sm:$0xff]   ;;  %v2897_v27 = vld [vmem:[%s4323_s1 + $0xf8] ss:$20 sps:$4 sm:$0xff]  }
   0xa   :  { %v2896_v26 = vld [vmem:[%s4323_s1 + $0xf0] ss:$20 sps:$4 sm:$0xff]   ;;  %v2902_v30 = vld [vmem:[%s4323_s1 + $0x118] ss:$20 sps:$4 sm:$0xff]   ;;  %v2903_v31 = vld [vmem:[%s4323_s1 + $0x120] ss:$20 sps:$4 sm:$0xff]  }
   0xb   :  { %1635 = vmatpush1.bf16.msra.mxu0 %v2872_v10  ;;  %1794 = vmatpush1.bf16.msra.mxu1 %v2873_v11  ;;  %v2898_v28 = vld [vmem:[%s4323_s1 + $0x11c] ss:$20 sps:$4 sm:$0xff]   ;;  %v2900_v29 = vld [vmem:[%s4323_s1 + $0x124] ss:$20 sps:$4 sm:$0xff]   ;;  %v2906_v33 = vld [vmem:[%s4323_s1 + $0x14c] ss:$20 sps:$4 sm:$0xff]  }
   0xc   :  { %1636 = vmatprep.subr.bf16.mxu0 %v2874_v12  ;;  %1795 = vmatprep.subr.bf16.mxu1 %v2876_v13  ;;  %v2904_v32 = vld [vmem:[%s4323_s1 + $0x144] ss:$20 sps:$4 sm:$0xff]   ;;  %v2908_v34 = vld [vmem:[%s4323_s1 + $0x140] ss:$20 sps:$4 sm:$0xff]   ;;  %v2909_v35 = vld [vmem:[%s4323_s1 + $0x148] ss:$20 sps:$4 sm:$0xff]  }
   0xd   :  { %v2910_v36 = vld [vmem:[%s4323_s1 + $0x16c] ss:$20 sps:$4 sm:$0xff]   ;;  %v2912_v37 = vld [vmem:[%s4323_s1 + $0x174] ss:$20 sps:$4 sm:$0xff]   ;;  %v2915_v39 = vld [vmem:[%s4323_s1 + $0x170] ss:$20 sps:$4 sm:$0xff]  }
   0xe   :  { %v2914_v38 = vld [vmem:[%s4323_s1 + $0x168] ss:$20 sps:$4 sm:$0xff]   ;;  %v2920_v42 = vld [vmem:[%s4323_s1 + $0x190] ss:$20 sps:$4 sm:$0xff]   ;;  %v2921_v43 = vld [vmem:[%s4323_s1 + $0x198] ss:$20 sps:$4 sm:$0xff]  }
   0xf   :  { %1637 = vmatpush1.bf16.msra.mxu0 %v2878_v14  ;;  %1796 = vmatpush1.bf16.msra.mxu1 %v2879_v15  ;;  %v2916_v40 = vld [vmem:[%s4323_s1 + $0x194] ss:$20 sps:$4 sm:$0xff]   ;;  %v2918_v41 = vld [vmem:[%s4323_s1 + $0x19c] ss:$20 sps:$4 sm:$0xff]   ;;  %v2924_v45 = vld [vmem:[%s4323_s1 + $0x1c4] ss:$20 sps:$4 sm:$0xff]  }
  0x10   :  { %1638 = vmatprep.subr.bf16.mxu0 %v2880_v16  ;;  %1797 = vmatprep.subr.bf16.mxu1 %v2882_v17  ;;  %v2922_v44 = vld [vmem:[%s4323_s1 + $0x1bc] ss:$20 sps:$4 sm:$0xff]   ;;  %v2926_v46 = vld [vmem:[%s4323_s1 + $0x1b8] ss:$20 sps:$4 sm:$0xff]   ;;  %v2927_v48 = vld [vmem:[%s4323_s1 + $0x1c0] ss:$20 sps:$4 sm:$0xff]  }
  0x11   :  { %v2952_v47 = vld [vmem:[%s4322_s0 + $0x4] ss:$24 sps:$4 sm:$0xff]   ;;  %v2930_v50 = vld [vmem:[%s4323_s1 + $0x1ec] ss:$20 sps:$4 sm:$0xff]   ;;  %v2936_v54 = vld [vmem:[%s4323_s1 + $0x214] ss:$20 sps:$4 sm:$0xff]  }
  0x12   :  { %v2928_v49 = vld [vmem:[%s4323_s1 + $0x1e4] ss:$20 sps:$4 sm:$0xff]   ;;  %1662 = vmatprep.mubr.bf16.mxu0 %v2952_v47  ;;  %1821 = vmatprep.mubr.bf16.mxu1 %v2952_v47  ;;  %v2932_v51 = vld [vmem:[%s4323_s1 + $0x1e0] ss:$20 sps:$4 sm:$0xff]   ;;  %v2933_v52 = vld [vmem:[%s4323_s1 + $0x1e8] ss:$20 sps:$4 sm:$0xff]  }
  0x13   :  { %1639 = vmatpush1.bf16.msra.mxu0 %v2884_v18  ;;  %1798 = vmatpush1.bf16.msra.mxu1 %v2885_v19  ;;  %v2934_v53 = vld [vmem:[%s4323_s1 + $0x20c] ss:$20 sps:$4 sm:$0xff]   ;;  %v2938_v55 = vld [vmem:[%s4323_s1 + $0x208] ss:$20 sps:$4 sm:$0xff]   ;;  %v2939_v56 = vld [vmem:[%s4323_s1 + $0x210] ss:$20 sps:$4 sm:$0xff]  }
  0x14   :  { %1640 = vmatprep.subr.bf16.mxu0 %v2886_v20  ;;  %1799 = vmatprep.subr.bf16.mxu1 %v2888_v21  ;;  %v2940_v57 = vld [vmem:[%s4323_s1 + $0x234] ss:$20 sps:$4 sm:$0xff]   ;;  %v2942_v58 = vld [vmem:[%s4323_s1 + $0x23c] ss:$20 sps:$4 sm:$0xff]   ;;  %v2945_v60 = vld [vmem:[%s4323_s1 + $0x238] ss:$20 sps:$4 sm:$0xff]  }
  0x15   :  { %v2944_v59 = vld [vmem:[%s4323_s1 + $0x230] ss:$20 sps:$4 sm:$0xff]   ;;  %v2950_v63 = vld [vmem:[%s4323_s1 + $0x258] ss:$20 sps:$4 sm:$0xff]   ;;  %v2951_v0 = vld [vmem:[%s4323_s1 + $0x260] ss:$20 sps:$4 sm:$0xff]  }
  0x16   :  { %v2946_v61 = vld [vmem:[%s4323_s1 + $0x25c] ss:$20 sps:$4 sm:$0xff]   ;;  %v2948_v62 = vld [vmem:[%s4323_s1 + $0x264] ss:$20 sps:$4 sm:$0xff]   ;;  %v2959_v2 = vld [vmem:[%s4323_s1 + $0x28c] ss:$20 sps:$4 sm:$0xff]  }
  0x17   :  { %1641 = vmatpush1.bf16.msra.mxu0 %v2890_v22  ;;  %1800 = vmatpush1.bf16.msra.mxu1 %v2891_v23  ;;  %v2956_v1 = vld [vmem:[%s4323_s1 + $0x284] ss:$20 sps:$4 sm:$0xff]   ;;  %v2954_v3 = vld [vmem:[%s4323_s1 + $0x280] ss:$20 sps:$4 sm:$0xff]   ;;  %v2957_v4 = vld [vmem:[%s4323_s1 + $0x288] ss:$20 sps:$4 sm:$0xff]  }
  0x18   :  { %1642 = vmatprep.subr.bf16.mxu0 %v2892_v24  ;;  %1801 = vmatprep.subr.bf16.mxu1 %v2894_v25  ;;  %v2960_v5 = vld [vmem:[%s4322_s0] ss:$24 sps:$4 sm:$0xff]   ;;  %v2966_v7 = vld [vmem:[%s4323_s1 + $0x2b4] ss:$20 sps:$4 sm:$0xff]   ;;  %v2964_v9 = vld [vmem:[%s4323_s1 + $0x2b0] ss:$20 sps:$4 sm:$0xff]  }
  0x19   :  { %v2963_v6 = vld [vmem:[%s4323_s1 + $0x2ac] ss:$20 sps:$4 sm:$0xff]   ;;  %v2961_v8 = vld [vmem:[%s4323_s1 + $0x2a8] ss:$20 sps:$4 sm:$0xff]   ;;  %v2967_v12 = vld [vmem:[%s4323_s1 + $0x2d0] ss:$20 sps:$4 sm:$0xff]  }
  0x1a   :  { %v2969_v10 = vld [vmem:[%s4323_s1 + $0x2d4] ss:$20 sps:$4 sm:$0xff]   ;;  %v2972_v11 = vld [vmem:[%s4323_s1 + $0x2dc] ss:$20 sps:$4 sm:$0xff]   ;;  %v2970_v13 = vld [vmem:[%s4323_s1 + $0x2d8] ss:$20 sps:$4 sm:$0xff]  }
  0x1b   :  { %1643 = vmatpush1.bf16.msra.mxu0 %v2896_v26  ;;  %1802 = vmatpush1.bf16.msra.mxu1 %v2897_v27  ;;  %v2975_v14 = vld [vmem:[%s4323_s1 + $0x2fc] ss:$20 sps:$4 sm:$0xff]   ;;  %v2978_v15 = vld [vmem:[%s4323_s1 + $0x304] ss:$20 sps:$4 sm:$0xff]   ;;  %v2976_v17 = vld [vmem:[%s4323_s1 + $0x300] ss:$20 sps:$4 sm:$0xff]  }
  0x1c   :  { %1644 = vmatprep.subr.bf16.mxu0 %v2898_v28  ;;  %1803 = vmatprep.subr.bf16.mxu1 %v2900_v29  ;;  %v2973_v16 = vld [vmem:[%s4323_s1 + $0x2f8] ss:$20 sps:$4 sm:$0xff]   ;;  %v2979_v20 = vld [vmem:[%s4323_s1 + $0x320] ss:$20 sps:$4 sm:$0xff]   ;;  %v2982_v21 = vld [vmem:[%s4323_s1 + $0x328] ss:$20 sps:$4 sm:$0xff]  }
  0x1d   :  { %v2981_v18 = vld [vmem:[%s4323_s1 + $0x324] ss:$20 sps:$4 sm:$0xff]   ;;  %v2984_v19 = vld [vmem:[%s4323_s1 + $0x32c] ss:$20 sps:$4 sm:$0xff]   ;;  %v2990_v23 = vld [vmem:[%s4323_s1 + $0x354] ss:$20 sps:$4 sm:$0xff]  }
  0x1e   :  { %v2987_v22 = vld [vmem:[%s4323_s1 + $0x34c] ss:$20 sps:$4 sm:$0xff]   ;;  %v2985_v25 = vld [vmem:[%s4323_s1 + $0x348] ss:$20 sps:$4 sm:$0xff]   ;;  %v2988_v26 = vld [vmem:[%s4323_s1 + $0x350] ss:$20 sps:$4 sm:$0xff]  }
  0x1f   :  { %1645 = vmatpush1.bf16.msra.mxu0 %v2902_v30  ;;  %1804 = vmatpush1.bf16.msra.mxu1 %v2903_v31  ;;  %v3536_v24 = vld [vmem:[%s4322_s0 + $0x34] ss:$24 sps:$4 sm:$0xff]   ;;  %v2996_v28 = vld [vmem:[%s4323_s1 + $0x37c] ss:$20 sps:$4 sm:$0xff]  }
  0x20   :  { %1646 = vmatprep.subr.bf16.mxu0 %v2904_v32  ;;  %1805 = vmatprep.subr.bf16.mxu1 %v2906_v33  ;;  %v2993_v27 = vld [vmem:[%s4323_s1 + $0x374] ss:$20 sps:$4 sm:$0xff]   ;;  %v2991_v30 = vld [vmem:[%s4323_s1 + $0x370] ss:$20 sps:$4 sm:$0xff]   ;;  %v2994_v31 = vld [vmem:[%s4323_s1 + $0x378] ss:$20 sps:$4 sm:$0xff]  }
  0x21   :  { %v3553_v29 = vld [vmem:[%s4322_s0 + $0x30] ss:$24 sps:$4 sm:$0xff]   ;;  %v3002_v33 = vld [vmem:[%s4323_s1 + $0x3a4] ss:$20 sps:$4 sm:$0xff]  }
  0x22   :  { %v2999_v32 = vld [vmem:[%s4323_s1 + $0x39c] ss:$20 sps:$4 sm:$0xff]  }
  0x23   :  { %1647 = vmatpush1.bf16.msra.mxu0 %v2908_v34  ;;  %1806 = vmatpush1.bf16.msra.mxu1 %v2909_v35  ;;  %v3574_v34 = vld [vmem:[%s4322_s0 + $0xc] ss:$24 sps:$4 sm:$0xff]  }
  0x24   :  { %1648 = vmatprep.subr.bf16.mxu0 %v2910_v36  ;;  %1807 = vmatprep.subr.bf16.mxu1 %v2912_v37  ;;  %v2997_v35 = vld [vmem:[%s4323_s1 + $0x398] ss:$20 sps:$4 sm:$0xff]   ;;  %v3000_v36 = vld [vmem:[%s4323_s1 + $0x3a0] ss:$20 sps:$4 sm:$0xff]   ;;  %v3015_v47 = vld [vmem:[%s4323_s1 + $0x410] ss:$20 sps:$4 sm:$0xff]  }
  0x25   :  { %v3005_v37 = vld [vmem:[%s4323_s1 + $0x3c4] ss:$20 sps:$4 sm:$0xff]  }
  0x27   :  { %1649 = vmatpush1.bf16.msra.mxu0 %v2914_v38  ;;  %1808 = vmatpush1.bf16.msra.mxu1 %v2915_v39  ;;  %v3008_v38 = vld [vmem:[%s4323_s1 + $0x3cc] ss:$20 sps:$4 sm:$0xff]  }
  0x28   :  { %1650 = vmatprep.subr.bf16.mxu0 %v2916_v40  ;;  %1809 = vmatprep.subr.bf16.mxu1 %v2918_v41  ;;  %v3003_v39 = vld [vmem:[%s4323_s1 + $0x3c0] ss:$20 sps:$4 sm:$0xff]   ;;  %v3006_v40 = vld [vmem:[%s4323_s1 + $0x3c8] ss:$20 sps:$4 sm:$0xff]  }
  0x29   :  { %v3011_v41 = vld [vmem:[%s4323_s1 + $0x3ec] ss:$20 sps:$4 sm:$0xff]  }
  0x2b   :  { %1651 = vmatpush1.bf16.msra.mxu0 %v2920_v42  ;;  %1810 = vmatpush1.bf16.msra.mxu1 %v2921_v43  ;;  %v3014_v42 = vld [vmem:[%s4323_s1 + $0x3f4] ss:$20 sps:$4 sm:$0xff]  }
  0x2c   :  { %1652 = vmatprep.subr.bf16.mxu0 %v2922_v44  ;;  %1811 = vmatprep.subr.bf16.mxu1 %v2924_v45  ;;  %v3009_v43 = vld [vmem:[%s4323_s1 + $0x3e8] ss:$20 sps:$4 sm:$0xff]   ;;  %v3012_v44 = vld [vmem:[%s4323_s1 + $0x3f0] ss:$20 sps:$4 sm:$0xff]  }
  0x2d   :  { %v3017_v45 = vld [vmem:[%s4323_s1 + $0x414] ss:$20 sps:$4 sm:$0xff]  }
  0x2f   :  { %1653 = vmatpush1.bf16.msra.mxu0 %v2926_v46  ;;  %1812 = vmatpush1.bf16.msra.mxu1 %v2927_v48  ;;  %v3020_v46 = vld [vmem:[%s4323_s1 + $0x41c] ss:$20 sps:$4 sm:$0xff]   ;;  %v3018_v48 = vld [vmem:[%s4323_s1 + $0x418] ss:$20 sps:$4 sm:$0xff]  }
  0x30   :  { %1654 = vmatprep.subr.bf16.mxu0 %v2928_v49  ;;  %1813 = vmatprep.subr.bf16.mxu1 %v2930_v50  ;;  %v3023_v49 = vld [vmem:[%s4323_s1 + $0x43c] ss:$20 sps:$4 sm:$0xff]   ;;  %v3026_v50 = vld [vmem:[%s4323_s1 + $0x444] ss:$20 sps:$4 sm:$0xff]  }
  0x33   :  { %1655 = vmatpush1.bf16.msra.mxu0 %v2932_v51  ;;  %1814 = vmatpush1.bf16.msra.mxu1 %v2933_v52  ;;  %v3021_v51 = vld [vmem:[%s4323_s1 + $0x438] ss:$20 sps:$4 sm:$0xff]   ;;  %v3024_v52 = vld [vmem:[%s4323_s1 + $0x440] ss:$20 sps:$4 sm:$0xff]  }
  0x34   :  { %1656 = vmatprep.subr.bf16.mxu0 %v2934_v53  ;;  %1815 = vmatprep.subr.bf16.mxu1 %v2936_v54  ;;  %v3029_v53 = vld [vmem:[%s4323_s1 + $0x464] ss:$20 sps:$4 sm:$0xff]   ;;  %v3032_v54 = vld [vmem:[%s4323_s1 + $0x46c] ss:$20 sps:$4 sm:$0xff]  }
  0x37   :  { %1657 = vmatpush1.bf16.msra.mxu0 %v2938_v55  ;;  %1816 = vmatpush1.bf16.msra.mxu1 %v2939_v56  ;;  %v3027_v55 = vld [vmem:[%s4323_s1 + $0x460] ss:$20 sps:$4 sm:$0xff]   ;;  %v3030_v56 = vld [vmem:[%s4323_s1 + $0x468] ss:$20 sps:$4 sm:$0xff]  }
  0x38   :  { %1658 = vmatprep.subr.bf16.mxu0 %v2940_v57  ;;  %1817 = vmatprep.subr.bf16.mxu1 %v2942_v58  ;;  %v3035_v57 = vld [vmem:[%s4323_s1 + $0x48c] ss:$20 sps:$4 sm:$0xff]   ;;  %v3038_v58 = vld [vmem:[%s4323_s1 + $0x494] ss:$20 sps:$4 sm:$0xff]  }
  0x3b   :  { %1659 = vmatpush1.bf16.msra.mxu0 %v2944_v59  ;;  %1818 = vmatpush1.bf16.msra.mxu1 %v2945_v60  ;;  %v3033_v59 = vld [vmem:[%s4323_s1 + $0x488] ss:$20 sps:$4 sm:$0xff]   ;;  %v3036_v60 = vld [vmem:[%s4323_s1 + $0x490] ss:$20 sps:$4 sm:$0xff]  }
  0x3c   :  { %1660 = vmatprep.subr.bf16.mxu0 %v2946_v61  ;;  %1819 = vmatprep.subr.bf16.mxu1 %v2948_v62  ;;  %v3043_v61 = vld [vmem:[%s4323_s1 + $0x4b4] ss:$20 sps:$4 sm:$0xff]   ;;  %v3046_v62 = vld [vmem:[%s4323_s1 + $0x4bc] ss:$20 sps:$4 sm:$0xff]  }
  0x3f   :  { %1661 = vmatpush1.bf16.msra.mxu0 %v2950_v63  ;;  %1820 = vmatpush1.bf16.msra.mxu1 %v2951_v0  ;;  %v3041_v63 = vld [vmem:[%s4323_s1 + $0x4b0] ss:$20 sps:$4 sm:$0xff]   ;;  %v3044_v0 = vld [vmem:[%s4323_s1 + $0x4b8] ss:$20 sps:$4 sm:$0xff]  }
  0x40   :  { %1683 = vmatprep.subr.bf16.mxu0 %v2956_v1  ;;  %1842 = vmatprep.subr.bf16.mxu1 %v2959_v2  ;;  %v3050_v1 = vld [vmem:[%s4323_s1 + $0x4dc] ss:$20 sps:$4 sm:$0xff]   ;;  %v3053_v2 = vld [vmem:[%s4323_s1 + $0x4e4] ss:$20 sps:$4 sm:$0xff]  }
  0x42   :  { %1663 = vmatmul.mubr.bf16.vlgmr.msra.gmra.mrb[0].mxu0 %v2960_v5  ;;  %1822 = vmatmul.mubr.bf16.vlgmr.msra.gmra.mrb[0].mxu1 %v2960_v5  ;;  %v3059_v5 = vld [vmem:[%s4323_s1 + $0x504] ss:$20 sps:$4 sm:$0xff]  }
  0x43   :  { %1684 = vmatpush1.bf16.msra.mxu0 %v2954_v3  ;;  %1843 = vmatpush1.bf16.msra.mxu1 %v2957_v4  ;;  %v3048_v3 = vld [vmem:[%s4323_s1 + $0x4d8] ss:$20 sps:$4 sm:$0xff]   ;;  %v3051_v4 = vld [vmem:[%s4323_s1 + $0x4e0] ss:$20 sps:$4 sm:$0xff]  }
  0x44   :  { %1685 = vmatprep.subr.bf16.mxu0 %v2963_v6  ;;  %1844 = vmatprep.subr.bf16.mxu1 %v2966_v7  ;;  %v3062_v6 = vld [vmem:[%s4323_s1 + $0x50c] ss:$20 sps:$4 sm:$0xff]  }
  0x45   :  { %1672 = vmatprep.mubr.bf16.mxu0 %v3536_v24  ;;  %1831 = vmatprep.mubr.bf16.mxu1 %v3536_v24  ;;  %v3689_v7 = vld [vmem:[%s4322_s0 + $0x8] ss:$24 sps:$4 sm:$0xff]  }
  0x47   :  { %1686 = vmatpush1.bf16.msra.mxu0 %v2961_v8  ;;  %1845 = vmatpush1.bf16.msra.mxu1 %v2964_v9  ;;  %v3057_v8 = vld [vmem:[%s4323_s1 + $0x500] ss:$20 sps:$4 sm:$0xff]   ;;  %v3060_v9 = vld [vmem:[%s4323_s1 + $0x508] ss:$20 sps:$4 sm:$0xff]  }
  0x48   :  { %1687 = vmatprep.subr.bf16.mxu0 %v2969_v10  ;;  %1846 = vmatprep.subr.bf16.mxu1 %v2972_v11  ;;  %v3065_v10 = vld [vmem:[%s4323_s1 + $0x52c] ss:$20 sps:$4 sm:$0xff]   ;;  %v3068_v11 = vld [vmem:[%s4323_s1 + $0x534] ss:$20 sps:$4 sm:$0xff]  }
  0x4a   :  { %1673 = vmatmul.mubr.bf16.gmra.mrb[4].mxu0 %v3553_v29  ;;  %1832 = vmatmul.mubr.bf16.gmra.mrb[4].mxu1 %v3553_v29 }
  0x4b   :  { %1688 = vmatpush1.bf16.msra.mxu0 %v2967_v12  ;;  %1847 = vmatpush1.bf16.msra.mxu1 %v2970_v13  ;;  %v3706_v12 = vld [vmem:[%s4322_s0 + $0x3c] ss:$24 sps:$4 sm:$0xff]  }
  0x4c   :  { %1689 = vmatprep.subr.bf16.mxu0 %v2975_v14  ;;  %1848 = vmatprep.subr.bf16.mxu1 %v2978_v15  ;;  %v3063_v13 = vld [vmem:[%s4323_s1 + $0x528] ss:$20 sps:$4 sm:$0xff]   ;;  %v3066_v14 = vld [vmem:[%s4323_s1 + $0x530] ss:$20 sps:$4 sm:$0xff]  }
  0x4d   :  { %1715 = vmatprep.mubr.bf16.mxu0 %v3574_v34  ;;  %1874 = vmatprep.mubr.bf16.mxu1 %v3574_v34  ;;  %v3071_v15 = vld [vmem:[%s4323_s1 + $0x554] ss:$20 sps:$4 sm:$0xff]  }
  0x4f   :  { %1690 = vmatpush1.bf16.msra.mxu0 %v2973_v16  ;;  %1849 = vmatpush1.bf16.msra.mxu1 %v2976_v17  ;;  %v3074_v16 = vld [vmem:[%s4323_s1 + $0x55c] ss:$20 sps:$4 sm:$0xff]  }
  0x50   :  { %1691 = vmatprep.subr.bf16.mxu0 %v2981_v18  ;;  %1850 = vmatprep.subr.bf16.mxu1 %v2984_v19  ;;  %v3069_v17 = vld [vmem:[%s4323_s1 + $0x550] ss:$20 sps:$4 sm:$0xff]   ;;  %v3072_v18 = vld [vmem:[%s4323_s1 + $0x558] ss:$20 sps:$4 sm:$0xff]  }
  0x51   :  { %v3733_v19 = vld [vmem:[%s4322_s0 + $0x38] ss:$24 sps:$4 sm:$0xff]  }
  0x53   :  { %1692 = vmatpush1.bf16.msra.mxu0 %v2979_v20  ;;  %1851 = vmatpush1.bf16.msra.mxu1 %v2982_v21  ;;  %v3077_v20 = vld [vmem:[%s4323_s1 + $0x57c] ss:$20 sps:$4 sm:$0xff]   ;;  %v3080_v21 = vld [vmem:[%s4323_s1 + $0x584] ss:$20 sps:$4 sm:$0xff]  }
  0x54   :  { %1693 = vmatprep.subr.bf16.mxu0 %v2987_v22  ;;  %1852 = vmatprep.subr.bf16.mxu1 %v2990_v23  ;;  %v3075_v22 = vld [vmem:[%s4323_s1 + $0x578] ss:$20 sps:$4 sm:$0xff]  }
  0x55   :  { %v3747_v23 = vld [vmem:[%s4322_s0 + $0x14] ss:$24 sps:$4 sm:$0xff]  }
  0x57   :  { %1694 = vmatpush1.bf16.msra.mxu0 %v2985_v25  ;;  %1853 = vmatpush1.bf16.msra.mxu1 %v2988_v26  ;;  %v3078_v25 = vld [vmem:[%s4323_s1 + $0x580] ss:$20 sps:$4 sm:$0xff]   ;;  %v3083_v26 = vld [vmem:[%s4323_s1 + $0x5a4] ss:$20 sps:$4 sm:$0xff]  }
  0x58   :  { %1695 = vmatprep.subr.bf16.mxu0 %v2993_v27  ;;  %1854 = vmatprep.subr.bf16.mxu1 %v2996_v28  ;;  %v3086_v27 = vld [vmem:[%s4323_s1 + $0x5ac] ss:$20 sps:$4 sm:$0xff]  }
  0x59   :  { %v3081_v28 = vld [vmem:[%s4323_s1 + $0x5a0] ss:$20 sps:$4 sm:$0xff]  }
  0x5b   :  { %1696 = vmatpush1.bf16.msra.mxu0 %v2991_v30  ;;  %1855 = vmatpush1.bf16.msra.mxu1 %v2994_v31  ;;  %v3084_v30 = vld [vmem:[%s4323_s1 + $0x5a8] ss:$20 sps:$4 sm:$0xff]   ;;  %v3089_v31 = vld [vmem:[%s4323_s1 + $0x5cc] ss:$20 sps:$4 sm:$0xff]  }
  0x5c   :  { %1697 = vmatprep.subr.bf16.mxu0 %v2999_v32  ;;  %1856 = vmatprep.subr.bf16.mxu1 %v3002_v33  ;;  %v3092_v32 = vld [vmem:[%s4323_s1 + $0x5d4] ss:$20 sps:$4 sm:$0xff]  }
  0x5d   :  { %v3087_v33 = vld [vmem:[%s4323_s1 + $0x5c8] ss:$20 sps:$4 sm:$0xff]  }
  0x5f   :  { %1698 = vmatpush1.bf16.msra.mxu0 %v2997_v35  ;;  %1857 = vmatpush1.bf16.msra.mxu1 %v3000_v36  ;;  %v3090_v35 = vld [vmem:[%s4323_s1 + $0x5d0] ss:$20 sps:$4 sm:$0xff]   ;;  %v3095_v36 = vld [vmem:[%s4323_s1 + $0x5f4] ss:$20 sps:$4 sm:$0xff]  }
  0x60   :  { %1699 = vmatprep.subr.bf16.mxu0 %v3005_v37  ;;  %1858 = vmatprep.subr.bf16.mxu1 %v3008_v38  ;;  %v3098_v37 = vld [vmem:[%s4323_s1 + $0x5fc] ss:$20 sps:$4 sm:$0xff]  }
  0x61   :  { %v3093_v38 = vld [vmem:[%s4323_s1 + $0x5f0] ss:$20 sps:$4 sm:$0xff]  }
  0x63   :  { %1700 = vmatpush1.bf16.msra.mxu0 %v3003_v39  ;;  %1859 = vmatpush1.bf16.msra.mxu1 %v3006_v40  ;;  %v3096_v39 = vld [vmem:[%s4323_s1 + $0x5f8] ss:$20 sps:$4 sm:$0xff]   ;;  %v3101_v40 = vld [vmem:[%s4323_s1 + $0x61c] ss:$20 sps:$4 sm:$0xff]  }
  0x64   :  { %1701 = vmatprep.subr.bf16.mxu0 %v3011_v41  ;;  %1860 = vmatprep.subr.bf16.mxu1 %v3014_v42  ;;  %v3104_v41 = vld [vmem:[%s4323_s1 + $0x624] ss:$20 sps:$4 sm:$0xff]  }
  0x65   :  { %v3099_v42 = vld [vmem:[%s4323_s1 + $0x618] ss:$20 sps:$4 sm:$0xff]  }
  0x67   :  { %1702 = vmatpush1.bf16.msra.mxu0 %v3009_v43  ;;  %1861 = vmatpush1.bf16.msra.mxu1 %v3012_v44  ;;  %v3102_v43 = vld [vmem:[%s4323_s1 + $0x620] ss:$20 sps:$4 sm:$0xff]   ;;  %v3107_v44 = vld [vmem:[%s4323_s1 + $0x644] ss:$20 sps:$4 sm:$0xff]  }
  0x68   :  { %1703 = vmatprep.subr.bf16.mxu0 %v3017_v45  ;;  %1862 = vmatprep.subr.bf16.mxu1 %v3020_v46  ;;  %v3110_v45 = vld [vmem:[%s4323_s1 + $0x64c] ss:$20 sps:$4 sm:$0xff]  }
  0x69   :  { %v3105_v46 = vld [vmem:[%s4323_s1 + $0x640] ss:$20 sps:$4 sm:$0xff]  }
  0x6b   :  { %1704 = vmatpush1.bf16.msra.mxu0 %v3015_v47  ;;  %1863 = vmatpush1.bf16.msra.mxu1 %v3018_v48  ;;  %v3108_v47 = vld [vmem:[%s4323_s1 + $0x648] ss:$20 sps:$4 sm:$0xff]   ;;  %v3113_v48 = vld [vmem:[%s4323_s1 + $0x66c] ss:$20 sps:$4 sm:$0xff]  }
  0x6c   :  { %1705 = vmatprep.subr.bf16.mxu0 %v3023_v49  ;;  %1864 = vmatprep.subr.bf16.mxu1 %v3026_v50  ;;  %v3116_v49 = vld [vmem:[%s4323_s1 + $0x674] ss:$20 sps:$4 sm:$0xff]  }
  0x6d   :  { %v3111_v50 = vld [vmem:[%s4323_s1 + $0x668] ss:$20 sps:$4 sm:$0xff]  }
  0x6f   :  { %1706 = vmatpush1.bf16.msra.mxu0 %v3021_v51  ;;  %1865 = vmatpush1.bf16.msra.mxu1 %v3024_v52  ;;  %v3114_v51 = vld [vmem:[%s4323_s1 + $0x670] ss:$20 sps:$4 sm:$0xff]   ;;  %v3119_v52 = vld [vmem:[%s4323_s1 + $0x694] ss:$20 sps:$4 sm:$0xff]  }
  0x70   :  { %1707 = vmatprep.subr.bf16.mxu0 %v3029_v53  ;;  %1866 = vmatprep.subr.bf16.mxu1 %v3032_v54  ;;  %v3122_v53 = vld [vmem:[%s4323_s1 + $0x69c] ss:$20 sps:$4 sm:$0xff]  }
  0x71   :  { %v3117_v54 = vld [vmem:[%s4323_s1 + $0x690] ss:$20 sps:$4 sm:$0xff]  }
  0x73   :  { %1708 = vmatpush1.bf16.msra.mxu0 %v3027_v55  ;;  %1867 = vmatpush1.bf16.msra.mxu1 %v3030_v56  ;;  %v3120_v55 = vld [vmem:[%s4323_s1 + $0x698] ss:$20 sps:$4 sm:$0xff]   ;;  %v3125_v56 = vld [vmem:[%s4323_s1 + $0x6bc] ss:$20 sps:$4 sm:$0xff]  }
  0x74   :  { %1709 = vmatprep.subr.bf16.mxu0 %v3035_v57  ;;  %1868 = vmatprep.subr.bf16.mxu1 %v3038_v58  ;;  %v3128_v57 = vld [vmem:[%s4323_s1 + $0x6c4] ss:$20 sps:$4 sm:$0xff]  }
  0x75   :  { %v3123_v58 = vld [vmem:[%s4323_s1 + $0x6b8] ss:$20 sps:$4 sm:$0xff]  }
  0x77   :  { %1710 = vmatpush1.bf16.msra.mxu0 %v3033_v59  ;;  %1869 = vmatpush1.bf16.msra.mxu1 %v3036_v60  ;;  %v3126_v59 = vld [vmem:[%s4323_s1 + $0x6c0] ss:$20 sps:$4 sm:$0xff]   ;;  %v3131_v60 = vld [vmem:[%s4323_s1 + $0x6e4] ss:$20 sps:$4 sm:$0xff]  }
  0x78   :  { %1711 = vmatprep.subr.bf16.mxu0 %v3043_v61  ;;  %1870 = vmatprep.subr.bf16.mxu1 %v3046_v62  ;;  %v3134_v61 = vld [vmem:[%s4323_s1 + $0x6ec] ss:$20 sps:$4 sm:$0xff]  }
  0x79   :  { %v3129_v62 = vld [vmem:[%s4323_s1 + $0x6e0] ss:$20 sps:$4 sm:$0xff]  }
  0x7b   :  { %1712 = vmatpush1.bf16.msra.mxu0 %v3041_v63  ;;  %1871 = vmatpush1.bf16.msra.mxu1 %v3044_v0  ;;  %v3132_v63 = vld [vmem:[%s4323_s1 + $0x6e8] ss:$20 sps:$4 sm:$0xff]   ;;  %v3137_v0 = vld [vmem:[%s4323_s1 + $0x70c] ss:$20 sps:$4 sm:$0xff]  }
  0x7c   :  { %1713 = vmatprep.subr.bf16.mxu0 %v3050_v1  ;;  %1872 = vmatprep.subr.bf16.mxu1 %v3053_v2  ;;  %v3140_v1 = vld [vmem:[%s4323_s1 + $0x714] ss:$20 sps:$4 sm:$0xff]  }
  0x7d   :  { %v3135_v2 = vld [vmem:[%s4323_s1 + $0x708] ss:$20 sps:$4 sm:$0xff]  }
  0x7f   :  { %1714 = vmatpush1.bf16.msra.mxu0 %v3048_v3  ;;  %1873 = vmatpush1.bf16.msra.mxu1 %v3051_v4  ;;  %v3138_v3 = vld [vmem:[%s4323_s1 + $0x710] ss:$20 sps:$4 sm:$0xff]   ;;  %v3146_v4 = vld [vmem:[%s4323_s1 + $0x734] ss:$20 sps:$4 sm:$0xff]  }
  0x80   :  { %1736 = vmatprep.subr.bf16.mxu0 %v3059_v5  ;;  %1895 = vmatprep.subr.bf16.mxu1 %v3062_v6  ;;  %v3149_v5 = vld [vmem:[%s4323_s1 + $0x73c] ss:$20 sps:$4 sm:$0xff]  }
  0x81   :  { %v3144_v6 = vld [vmem:[%s4323_s1 + $0x730] ss:$20 sps:$4 sm:$0xff]  }
  0x82   :  { %1716 = vmatmul.mubr.bf16.vlgmr.msra.gmra.mrb[0].mxu0 %v3689_v7  ;;  %1875 = vmatmul.mubr.bf16.vlgmr.msra.gmra.mrb[0].mxu1 %v3689_v7 }
  0x83   :  { %1737 = vmatpush1.bf16.msra.mxu0 %v3057_v8  ;;  %1896 = vmatpush1.bf16.msra.mxu1 %v3060_v9  ;;  %v3147_v8 = vld [vmem:[%s4323_s1 + $0x738] ss:$20 sps:$4 sm:$0xff]  }
  0x84   :  { %1738 = vmatprep.subr.bf16.mxu0 %v3065_v10  ;;  %1897 = vmatprep.subr.bf16.mxu1 %v3068_v11 }
  0x85   :  { %1725 = vmatprep.mubr.bf16.mxu0 %v3706_v12  ;;  %1884 = vmatprep.mubr.bf16.mxu1 %v3706_v12 }
  0x87   :  { %1739 = vmatpush1.bf16.msra.mxu0 %v3063_v13  ;;  %1898 = vmatpush1.bf16.msra.mxu1 %v3066_v14 }
  0x88   :  { %1740 = vmatprep.subr.bf16.mxu0 %v3071_v15  ;;  %1899 = vmatprep.subr.bf16.mxu1 %v3074_v16 }
  0x8a   :  { %1726 = vmatmul.mubr.bf16.gmra.mrb[4].mxu0 %v3733_v19  ;;  %1885 = vmatmul.mubr.bf16.gmra.mrb[4].mxu1 %v3733_v19 }
  0x8b   :  { %1741 = vmatpush1.bf16.msra.mxu0 %v3069_v17  ;;  %1900 = vmatpush1.bf16.msra.mxu1 %v3072_v18 }
  0x8c   :  { %1742 = vmatprep.subr.bf16.mxu0 %v3077_v20  ;;  %1901 = vmatprep.subr.bf16.mxu1 %v3080_v21 }
  0x8d   :  { %1768 = vmatprep.mubr.bf16.mxu0 %v3747_v23  ;;  %1927 = vmatprep.mubr.bf16.mxu1 %v3747_v23 }
  0x8f   :  { %1743 = vmatpush1.bf16.msra.mxu0 %v3075_v22  ;;  %1902 = vmatpush1.bf16.msra.mxu1 %v3078_v25 }
  0x90   :  { %1744 = vmatprep.subr.bf16.mxu0 %v3083_v26  ;;  %1903 = vmatprep.subr.bf16.mxu1 %v3086_v27 }
  0x93   :  { %1745 = vmatpush1.bf16.msra.mxu0 %v3081_v28  ;;  %1904 = vmatpush1.bf16.msra.mxu1 %v3084_v30 }
  0x94   :  { %1746 = vmatprep.subr.bf16.mxu0 %v3089_v31  ;;  %1905 = vmatprep.subr.bf16.mxu1 %v3092_v32 }
  0x97   :  { %1747 = vmatpush1.bf16.msra.mxu0 %v3087_v33  ;;  %1906 = vmatpush1.bf16.msra.mxu1 %v3090_v35 }
  0x98   :  { %1748 = vmatprep.subr.bf16.mxu0 %v3095_v36  ;;  %1907 = vmatprep.subr.bf16.mxu1 %v3098_v37 }
  0x9b   :  { %1749 = vmatpush1.bf16.msra.mxu0 %v3093_v38  ;;  %1908 = vmatpush1.bf16.msra.mxu1 %v3096_v39 }
  0x9c   :  { %1750 = vmatprep.subr.bf16.mxu0 %v3101_v40  ;;  %1909 = vmatprep.subr.bf16.mxu1 %v3104_v41 }
  0x9f   :  { %1751 = vmatpush1.bf16.msra.mxu0 %v3099_v42  ;;  %1910 = vmatpush1.bf16.msra.mxu1 %v3102_v43 }
  0xa0   :  { %1752 = vmatprep.subr.bf16.mxu0 %v3107_v44  ;;  %1911 = vmatprep.subr.bf16.mxu1 %v3110_v45 }
  0xa3   :  { %1753 = vmatpush1.bf16.msra.mxu0 %v3105_v46  ;;  %1912 = vmatpush1.bf16.msra.mxu1 %v3108_v47 }
  0xa4   :  { %1754 = vmatprep.subr.bf16.mxu0 %v3113_v48  ;;  %1913 = vmatprep.subr.bf16.mxu1 %v3116_v49 }
  0xa7   :  { %1755 = vmatpush1.bf16.msra.mxu0 %v3111_v50  ;;  %1914 = vmatpush1.bf16.msra.mxu1 %v3114_v51 }
  0xa8   :  { %1756 = vmatprep.subr.bf16.mxu0 %v3119_v52  ;;  %1915 = vmatprep.subr.bf16.mxu1 %v3122_v53 }
  0xab   :  { %1757 = vmatpush1.bf16.msra.mxu0 %v3117_v54  ;;  %1916 = vmatpush1.bf16.msra.mxu1 %v3120_v55 }
  0xac   :  { %1758 = vmatprep.subr.bf16.mxu0 %v3125_v56  ;;  %1917 = vmatprep.subr.bf16.mxu1 %v3128_v57 }
  0xaf   :  { %1759 = vmatpush1.bf16.msra.mxu0 %v3123_v58  ;;  %1918 = vmatpush1.bf16.msra.mxu1 %v3126_v59 }
  0xb0   :  { %1760 = vmatprep.subr.bf16.mxu0 %v3131_v60  ;;  %1919 = vmatprep.subr.bf16.mxu1 %v3134_v61 }
  0xb3   :  { %1761 = vmatpush1.bf16.msra.mxu0 %v3129_v62  ;;  %1920 = vmatpush1.bf16.msra.mxu1 %v3132_v63 }
  0xb4   :  { %1762 = vmatprep.subr.bf16.mxu0 %v3137_v0  ;;  %1921 = vmatprep.subr.bf16.mxu1 %v3140_v1 }
  0xb7   :  { %1763 = vmatpush1.bf16.msra.mxu0 %v3135_v2  ;;  %1922 = vmatpush1.bf16.msra.mxu1 %v3138_v3 }
  0xb8   :  { %10 = vsyncpa [#allocation3], 0  ;;  %1764 = vmatprep.subr.bf16.mxu0 %v3146_v4  ;;  %1923 = vmatprep.subr.bf16.mxu1 %v3149_v5  ;;  %v3152_v9 = vld [vmem:[%s4323_s1 + $0x75c] ss:$20 sps:$4 sm:$0xff]   ;;  %v3155_v10 = vld [vmem:[%s4323_s1 + $0x764] ss:$20 sps:$4 sm:$0xff]  }
  0xb9   :  { %v3150_v11 = vld [vmem:[%s4323_s1 + $0x758] ss:$20 sps:$4 sm:$0xff]   ;;  %v3153_v13 = vld [vmem:[%s4323_s1 + $0x760] ss:$20 sps:$4 sm:$0xff]   ;;  %v3159_v14 = vld [vmem:[%s4323_s1 + $0x150] ss:$20 sps:$4 sm:$0xff]  }
  0xba   :  { %v3160_v15 = vld [vmem:[%s4323_s1 + $0x3d0] ss:$20 sps:$4 sm:$0xff]   ;;  %v3163_v20 = vld [vmem:[%s4323_s1 + $0x178] ss:$20 sps:$4 sm:$0xff]   ;;  %v3170_v27 = vld [vmem:[%s4323_s1 + $0x1a0] ss:$20 sps:$4 sm:$0xff]  }
  0xbb   :  { %1765 = vmatpush1.bf16.msra.mxu0 %v3144_v6  ;;  %1924 = vmatpush1.bf16.msra.mxu1 %v3147_v8  ;;  %v3909_v16 = vld [vmem:[%s4322_s0 + $0x10] ss:$24 sps:$4 sm:$0xff]   ;;  %v3164_v21 = vld [vmem:[%s4323_s1 + $0x3f8] ss:$20 sps:$4 sm:$0xff]   ;;  %v3926_v22 = vld [vmem:[%s4322_s0 + $0x44] ss:$24 sps:$4 sm:$0xff]  }
  0xbc   :  { %1766 = vmatprep.subr.bf16.mxu0 %v3152_v9  ;;  %1925 = vmatprep.subr.bf16.mxu1 %v3155_v10  ;;  %v3161_v17 = vld [vmem:[%s4323_s1 + $0x10] ss:$20 sps:$4 sm:$0xff]   ;;  %v3165_v25 = vld [vmem:[%s4323_s1 + $0x38] ss:$20 sps:$4 sm:$0xff]   ;;  %v3171_v28 = vld [vmem:[%s4323_s1 + $0x420] ss:$20 sps:$4 sm:$0xff]  }
  0xbd   :  { %v3162_v18 = vld [vmem:[%s4323_s1 + $0x290] ss:$20 sps:$4 sm:$0xff]   ;;  %v3166_v26 = vld [vmem:[%s4323_s1 + $0x2b8] ss:$20 sps:$4 sm:$0xff]   ;;  %v3172_v31 = vld [vmem:[%s4323_s1 + $0x60] ss:$20 sps:$4 sm:$0xff]  }
  0xbe   :  { %v3947_v30 = vld [vmem:[%s4322_s0 + $0x40] ss:$24 sps:$4 sm:$0xff]   ;;  %v3174_v33 = vld [vmem:[%s4323_s1 + $0x1c8] ss:$20 sps:$4 sm:$0xff]   ;;  %v3178_v38 = vld [vmem:[%s4323_s1 + $0x1f0] ss:$20 sps:$4 sm:$0xff]  }
  0xbf   :  { %1767 = vmatpush1.bf16.msra.mxu0 %v3150_v11  ;;  %1926 = vmatpush1.bf16.msra.mxu1 %v3153_v13  ;;  %v3173_v32 = vld [vmem:[%s4323_s1 + $0x2e0] ss:$20 sps:$4 sm:$0xff]   ;;  %v3175_v35 = vld [vmem:[%s4323_s1 + $0x448] ss:$20 sps:$4 sm:$0xff]   ;;  %v3179_v39 = vld [vmem:[%s4323_s1 + $0x470] ss:$20 sps:$4 sm:$0xff]  }
  0xc0   :  { %2701 = vmatprep.subr.bf16.mxu0 %v3159_v14  ;;  %2729 = vmatprep.subr.bf16.mxu1 %v3160_v15  ;;  %v3176_v36 = vld [vmem:[%s4323_s1 + $0x88] ss:$20 sps:$4 sm:$0xff]   ;;  %v3180_v41 = vld [vmem:[%s4323_s1 + $0xb0] ss:$20 sps:$4 sm:$0xff]   ;;  %v3182_v43 = vld [vmem:[%s4323_s1 + $0x218] ss:$20 sps:$4 sm:$0xff]  }
  0xc1   :  { %v3177_v37 = vld [vmem:[%s4323_s1 + $0x308] ss:$20 sps:$4 sm:$0xff]   ;;  %v3181_v42 = vld [vmem:[%s4323_s1 + $0x330] ss:$20 sps:$4 sm:$0xff]   ;;  %v3184_v44 = vld [vmem:[%s4323_s1 + $0xd8] ss:$20 sps:$4 sm:$0xff]  }
  0xc2   :  { %1769 = vmatmul.mubr.bf16.vlgmr.msra.gmra.mrb[0].mxu0 %v3909_v16  ;;  %1928 = vmatmul.mubr.bf16.vlgmr.msra.gmra.mrb[0].mxu1 %v3909_v16  ;;  %v3210_v40 = vld [vmem:[%s4322_s0 + $0x4] ss:$24 sps:$4 sm:$0xff]   ;;  %v3185_v45 = vld [vmem:[%s4323_s1 + $0x358] ss:$20 sps:$4 sm:$0xff]   ;;  %v3186_v46 = vld [vmem:[%s4323_s1 + $0x240] ss:$20 sps:$4 sm:$0xff]  }
  0xc3   :  { %2702 = vmatpush3.bf16.msra.mxu0 %v3161_v17  ;;  %2730 = vmatpush3.bf16.msra.mxu1 %v3162_v18  ;;  %v3187_v47 = vld [vmem:[%s4323_s1 + $0x4c0] ss:$20 sps:$4 sm:$0xff]   ;;  %v3190_v50 = vld [vmem:[%s4323_s1 + $0x268] ss:$20 sps:$4 sm:$0xff]   ;;  %v3194_v54 = vld [vmem:[%s4323_s1 + $0x650] ss:$20 sps:$4 sm:$0xff]  }
  0xc4   :  { %2703 = vmatprep.subr.bf16.mxu0 %v3163_v20  ;;  %2731 = vmatprep.subr.bf16.mxu1 %v3164_v21  ;;  %v3188_v48 = vld [vmem:[%s4323_s1 + $0x100] ss:$20 sps:$4 sm:$0xff]   ;;  %v3191_v51 = vld [vmem:[%s4323_s1 + $0x4e8] ss:$20 sps:$4 sm:$0xff]   ;;  %v3195_v55 = vld [vmem:[%s4323_s1 + $0x510] ss:$20 sps:$4 sm:$0xff]  }
  0xc5   :  { %1778 = vmatprep.mubr.bf16.mxu0 %v3926_v22  ;;  %1937 = vmatprep.mubr.bf16.mxu1 %v3926_v22  ;;  %v3189_v49 = vld [vmem:[%s4323_s1 + $0x380] ss:$20 sps:$4 sm:$0xff]   ;;  %v3192_v52 = vld [vmem:[%s4323_s1 + $0x128] ss:$20 sps:$4 sm:$0xff]   ;;  %v3196_v56 = vld [vmem:[%s4323_s1 + $0x678] ss:$20 sps:$4 sm:$0xff]  }
  0xc6   :  { %v3193_v53 = vld [vmem:[%s4323_s1 + $0x3a8] ss:$20 sps:$4 sm:$0xff]   ;;  %v3211_v57 = vld [vmem:[%s4322_s0] ss:$24 sps:$4 sm:$0xff]   ;;  %v3203_v61 = vld [vmem:[%s4323_s1 + $0x5b0] ss:$20 sps:$4 sm:$0xff]  }
  0xc7   :  { %2704 = vmatpush3.bf16.msra.mxu0 %v3165_v25  ;;  %2732 = vmatpush3.bf16.msra.mxu1 %v3166_v26  ;;  %v3197_v58 = vld [vmem:[%s4323_s1 + $0x538] ss:$20 sps:$4 sm:$0xff]   ;;  %v3198_v59 = vld [vmem:[%s4323_s1 + $0x6a0] ss:$20 sps:$4 sm:$0xff]   ;;  %v3208_v63 = vld [vmem:[%s4323_s1 + $0x768] ss:$20 sps:$4 sm:$0xff]  }
  0xc8   :  { %2705 = vmatprep.subr.bf16.mxu0 %v3170_v27  ;;  %2733 = vmatprep.subr.bf16.mxu1 %v3171_v28  ;;  %v3199_v60 = vld [vmem:[%s4323_s1 + $0x560] ss:$20 sps:$4 sm:$0xff]   ;;  %v3209_v0 = vld [vmem:[%s4323_s1 + $0x628] ss:$20 sps:$4 sm:$0xff]   ;;  %vm2099_vm0 = vcmask 1046528   ;;  %vm2172_vm1 = vcmask 1045504  }
  0xc9   :  { %v3207_v62 = vld [vmem:[%s4323_s1 + $0x600] ss:$20 sps:$4 sm:$0xff]   ;;  %vm2250_vm2 = vcmask 1044480   ;;  %vm2188_vm3 = vcmask 521216   ;;  %vm2122_vm4 = vcmask 523264   ;;  %vm2295_vm5 = vcmask 1041409  }
  0xca   :  { %1779 = vmatmul.mubr.bf16.gmra.mrb[4].mxu0 %v3947_v30  ;;  %1938 = vmatmul.mubr.bf16.gmra.mrb[4].mxu1 %v3947_v30  ;;  %vm2275_vm6 = vcmask 1044992   ;;  %vm2273_vm7 = vcmask 1048064   ;;  %vm2124_vm8 = vcmask 522240   ;;  %s3238_s23 = smov [#allocation2]   ;;  %vm2431_vm9 = vcmask 25600  }
  0xcb   :  { %2706 = vmatpush3.bf16.msra.mxu0 %v3172_v31  ;;  %2734 = vmatpush3.bf16.msra.mxu1 %v3173_v32 }
  0xcc   :  { %2707 = vmatprep.subr.bf16.mxu0 %v3174_v33  ;;  %2735 = vmatprep.subr.bf16.mxu1 %v3175_v35 }
  0xcd   :  { %1980 = vmatprep.mubr.bf16.mxu0 %v3210_v40  ;;  %2029 = vmatprep.mubr.bf16.mxu1 %v3574_v34  ;;  %v3183_v34 = vld [vmem:[%s4323_s1 + $0x498] ss:$20 sps:$4 sm:$0xff]  }
  0xcf   :  { %2708 = vmatpush3.bf16.msra.mxu0 %v3176_v36  ;;  %2736 = vmatpush3.bf16.msra.mxu1 %v3177_v37 }
  0xd0   :  { %2709 = vmatprep.subr.bf16.mxu0 %v3178_v38  ;;  %2737 = vmatprep.subr.bf16.mxu1 %v3179_v39 }
  0xd3   :  { %2710 = vmatpush3.bf16.msra.mxu0 %v3180_v41  ;;  %2738 = vmatpush3.bf16.msra.mxu1 %v3181_v42 }
  0xd4   :  { %2711 = vmatprep.subr.bf16.mxu0 %v3182_v43  ;;  %2739 = vmatprep.subr.bf16.mxu1 %v3183_v34 }
  0xd7   :  { %2712 = vmatpush3.bf16.msra.mxu0 %v3184_v44  ;;  %2740 = vmatpush3.bf16.msra.mxu1 %v3185_v45 }
  0xd8   :  { %2713 = vmatprep.subr.bf16.mxu0 %v3186_v46  ;;  %2741 = vmatprep.subr.bf16.mxu1 %v3187_v47 }
  0xdb   :  { %2714 = vmatpush3.bf16.msra.mxu0 %v3188_v48  ;;  %2742 = vmatpush3.bf16.msra.mxu1 %v3189_v49 }
  0xdc   :  { %2715 = vmatprep.subr.bf16.mxu0 %v3190_v50  ;;  %2743 = vmatprep.subr.bf16.mxu1 %v3191_v51 }
  0xdf   :  { %2716 = vmatpush3.bf16.msra.mxu0 %v3192_v52  ;;  %2744 = vmatpush3.bf16.msra.mxu1 %v3193_v53 }
  0xe0   :  { %2757 = vmatprep.subr.bf16.mxu0 %v3194_v54 }
  0xe2   :  { %1981 = vmatmul.mubr.bf16.vlgmr.msra.gmra.mrb[8].mxu0 %v3211_v57  ;;  %2030 = vmatmul.mubr.bf16.vlgmr.msra.gmra.mrb[8].mxu1 %v3689_v7  ;;  %v3200_v7 = vld [vmem:[%s4323_s1 + $0x6c8] ss:$20 sps:$4 sm:$0xff]  }
  0xe3   :  { %2758 = vmatpush3.bf16.msra.mxu0 %v3195_v55  ;;  %1988 = vmatprep.mubr.bf16.mxu0 %v3536_v24  ;;  %v3201_v24 = vld [vmem:[%s4323_s1 + $0x588] ss:$20 sps:$4 sm:$0xff]  }
  0xe4   :  { %2759 = vmatprep.subr.bf16.mxu0 %v3196_v56  ;;  %2037 = vmatprep.mubr.bf16.mxu1 %v3706_v12  ;;  %v3202_v12 = vld [vmem:[%s4323_s1 + $0x6f0] ss:$20 sps:$4 sm:$0xff]  }
  0xe7   :  { %2760 = vmatpush3.bf16.msra.mxu0 %v3197_v58 }
  0xe8   :  { %2761 = vmatprep.subr.bf16.mxu0 %v3198_v59 }
  0xea   :  { %1989 = vmatmul.mubr.bf16.gmra.mrb[12].mxu0 %v3553_v29  ;;  %2038 = vmatmul.mubr.bf16.gmra.mrb[12].mxu1 %v3733_v19  ;;  %v3204_v29 = vld [vmem:[%s4323_s1 + $0x718] ss:$20 sps:$4 sm:$0xff]  }
  0xeb   :  { %2762 = vmatpush3.bf16.msra.mxu0 %v3199_v60  ;;  %2078 = vmatprep.mubr.bf16.mxu0 %v3747_v23  ;;  %v3205_v19 = vld [vmem:[%s4323_s1 + $0x5d8] ss:$20 sps:$4 sm:$0xff]   ;;  %v3206_v23 = vld [vmem:[%s4323_s1 + $0x740] ss:$20 sps:$4 sm:$0xff]   ;;  %s3236_s1 = smov 64  }
  0xec   :  { %2763 = vmatprep.subr.bf16.mxu0 %v3200_v7 }
  0xef   :  { %2764 = vmatpush3.bf16.msra.mxu0 %v3201_v24 }
  0xf0   :  { %2765 = vmatprep.subr.bf16.mxu0 %v3202_v12 }
  0xf3   :  { %2766 = vmatpush3.bf16.msra.mxu0 %v3203_v61 }
  0xf4   :  { %2767 = vmatprep.subr.bf16.mxu0 %v3204_v29 }
  0xf7   :  { %2768 = vmatpush3.bf16.msra.mxu0 %v3205_v19 }
  0xf8   :  { %2769 = vmatprep.subr.bf16.mxu0 %v3206_v23 }
  0xfb   :  { %2770 = vmatpush3.bf16.msra.mxu0 %v3207_v62 }
  0xfc   :  { %2771 = vmatprep.subr.bf16.mxu0 %v3208_v63 }
  0xff   :  { %2772 = vmatpush3.bf16.msra.mxu0 %v3209_v0 }
 0x102   :  { %2079 = vmatmul.mubr.bf16.vlgmr.msra.gmra.mrb[16].mxu0 %v3909_v16 }
 0x103   :  { %2086 = vmatprep.mubr.bf16.mxu0 %v3926_v22 }
 0x10a   :  { %2087 = vmatmul.mubr.bf16.gmra.mrb[20].mxu0 %v3947_v30 }
 0x195   :  { %v4081_v1 = vpop.f32.mrb[0].mxu0  ;;  %v4083_v2 = vpop.f32.mrb[0].mxu1 }
 0x196   :  { %v4085_v3 = vpop.f32.mrb[1].mxu0  ;;  %v1931_v4 = vpop.f32.mrb[1].mxu1  ;;  %v2100_v5 = vrot.slane %v4081_v1, 1  ;;  %v2173_v6 = vrot.slane %v4083_v2, 2 }
 0x197   :  { %v4089_v8 = vpop.f32.mrb[2].mxu0  ;;  %v4091_v9 = vpop.f32.mrb[2].mxu1  ;;  %v2146_v10 = vrot.slane %v4085_v3, 1  ;;  %v2210_v11 = vrot.slane %v1931_v4, 1  ;;  %v2232_v17 = vrot.slane %v1931_v4, 2 }
 0x198   :  { %v2101_v13 = vrot.slane %v4089_v8, 1  ;;  %v2174_v14 = vrot.slane %v4091_v9, 2  ;;  %v4096_v15 = vpop.f32.mrb[3].mxu0  ;;  %v4098_v16 = vpop.f32.mrb[3].mxu1 }
 0x199   :  { %v2233_v18 = vrot.slane %v4098_v16, 2  ;;  %v2211_v20 = vrot.slane %v4098_v16, 1  ;;  %v2147_v21 = vrot.slane %v4096_v15, 1 }
 0x19a   :  { %v4106_v22 = vsel %vm2099_vm0, %v2100_v5, %v2101_v13  ;;  %v4111_v25 = vsel %vm2172_vm1, %v2173_v6, %v2174_v14 }
 0x19b   :  { %2218 = vrot.lane.b32.xlu0 %v2211_v20, %s3236_s1  ;;  %2154 = vrot.lane.b32.xlu1 %v2147_v21, %s3236_s1  ;;  %v2212_v26 = vsel %vm2099_vm0, %v2210_v11, %v2211_v20  ;;  %v2148_v27 = vsel %vm2099_vm0, %v2146_v10, %v2147_v21  ;;  %v4120_v28 = vsel %vm2172_vm1, %v2232_v17, %v2233_v18 }
 0x19d   :  { %v4122_v30 = vpop.f32.mrb[4].mxu0  ;;  %v4124_v31 = vpop.f32.mrb[4].mxu1 }
 0x19e   :  { %v4126_v32 = vpop.f32.mrb[5].mxu0  ;;  %v1941_v33 = vpop.f32.mrb[5].mxu1  ;;  %v2103_v35 = vrot.slane %v4122_v30, 1  ;;  %v2176_v36 = vrot.slane %v4124_v31, 2 }
 0x19f   :  { %2216 = vrot.lane.b32.xlu0 %v2212_v26, %s3236_s1  ;;  %v4131_v37 = vpop.f32.mrb[6].mxu0  ;;  %v4133_v38 = vpop.f32.mrb[6].mxu1  ;;  %v2149_v39 = vrot.slane %v4126_v32, 1  ;;  %v2213_v40 = vrot.slane %v1941_v33, 1  ;;  %v2235_v44 = vrot.slane %v1941_v33, 2 }
 0x1a0   :  { %v2104_v41 = vrot.slane %v4131_v37, 1  ;;  %v2177_v42 = vrot.slane %v4133_v38, 2  ;;  %v4138_v43 = vpop.f32.mrb[7].mxu0  ;;  %v4140_v34 = vpop.f32.mrb[7].mxu1 }
 0x1a1   :  { %v2150_v45 = vrot.slane %v4138_v43, 1  ;;  %v2214_v46 = vrot.slane %v4140_v34, 1  ;;  %v2236_v47 = vrot.slane %v4140_v34, 2 }
 0x1a2   :  { %v4148_v48 = vsel %vm2099_vm0, %v2103_v35, %v2104_v41  ;;  %v4153_v49 = vsel %vm2172_vm1, %v2176_v36, %v2177_v42 }
 0x1a3   :  { %2222 = vrot.lane.b32.xlu1 %v2214_v46, %s3236_s1  ;;  %2152 = vrot.lane.b32.xlu0 %v2148_v27, %s3236_s1  ;;  %v2151_v50 = vsel %vm2099_vm0, %v2149_v39, %v2150_v45  ;;  %v2215_v51 = vsel %vm2099_vm0, %v2213_v40, %v2214_v46  ;;  %v4162_v52 = vsel %vm2172_vm1, %v2235_v44, %v2236_v47 }
 0x1a7   :  { %2158 = vrot.lane.b32.xlu1 %v2150_v45, %s3236_s1  ;;  %2156 = vrot.lane.b32.xlu0 %v2151_v50, %s3236_s1 }
 0x1ab   :  { %2220 = vrot.lane.b32.xlu1 %v2215_v51, %s3236_s1 }
 0x1b5   :  { %v2717_v53 = vpop.f32.mrb[8].mxu0  ;;  %v2745_v54 = vpop.f32.mrb[8].mxu1 }
 0x1b6   :  { %v2718_v55 = vpop.f32.mrb[9].mxu0  ;;  %v2746_v56 = vpop.f32.mrb[9].mxu1 }
 0x1b7   :  { %v2719_v57 = vadd.f32 %v2718_v55, %v2717_v53  ;;  %v2747_v58 = vadd.f32 %v2746_v56, %v2745_v54  ;;  %v2720_v59 = vpop.f32.mrb[10].mxu0  ;;  %v2748_v60 = vpop.f32.mrb[10].mxu1 }
 0x1b8   :  { %v2721_v7 = vpop.f32.mrb[11].mxu0  ;;  %v2749_v24 = vpop.f32.mrb[11].mxu1 }
 0x1b9   :  { %v2032_v12 = vadd.f32 %v2747_v58, %v2719_v57  ;;  %v2722_v61 = vadd.f32 %v2721_v7, %v2720_v59  ;;  %v2750_v29 = vadd.f32 %v2749_v24, %v2748_v60 }
 0x1bb   :  { %v2035_v19 = vadd.f32 %v2750_v29, %v2722_v61 }
 0x1bd   :  { %v2723_v23 = vpop.f32.mrb[12].mxu0  ;;  %v2751_v62 = vpop.f32.mrb[12].mxu1 }
 0x1be   :  { %v2724_v63 = vpop.f32.mrb[13].mxu0  ;;  %v2752_v0 = vpop.f32.mrb[13].mxu1 }
 0x1bf   :  { %v2725_v4 = vadd.f32 %v2724_v63, %v2723_v23  ;;  %v2753_v5 = vadd.f32 %v2752_v0, %v2751_v62  ;;  %v2726_v6 = vpop.f32.mrb[14].mxu0  ;;  %v2754_v10 = vpop.f32.mrb[14].mxu1 }
 0x1c0   :  { %v2727_v11 = vpop.f32.mrb[15].mxu0  ;;  %v2755_v17 = vpop.f32.mrb[15].mxu1 }
 0x1c1   :  { %v2040_v20 = vadd.f32 %v2753_v5, %v2725_v4  ;;  %v2728_v21 = vadd.f32 %v2727_v11, %v2726_v6  ;;  %v2756_v26 = vadd.f32 %v2755_v17, %v2754_v10 }
 0x1c3   :  { %v2043_v27 = vadd.f32 %v2756_v26, %v2728_v21 }
 0x1d5   :  { %v2773_v33 = vpop.f32.mrb[16].mxu0 }
 0x1d6   :  { %v2774_v35 = vpop.f32.mrb[17].mxu0 }
 0x1d7   :  { %v2775_v36 = vadd.f32 %v2774_v35, %v2773_v33  ;;  %v2776_v39 = vpop.f32.mrb[18].mxu0 }
 0x1d8   :  { %v2777_v40 = vpop.f32.mrb[19].mxu0 }
 0x1d9   :  { %v2081_v44 = vadd.f32 %v2775_v36, %v2032_v12  ;;  %v2778_v45 = vadd.f32 %v2777_v40, %v2776_v39  ;;  %v3237_v39 = vmov 0.0|0.0   ;;  %v2330_v40 = vld [vmem:[%s4325_s3 + $0x18] sm:$0xff] }
 0x1da   :  { %2785 = vmatprep.subr.bf16.mxu1 %v3237_v39 }
 0x1db   :  { %v2084_v46 = vadd.f32 %v2778_v45, %v2035_v19  ;;  %v2251_v50 = vrot.slane %v2081_v44, 3 }
 0x1dd   :  { %v2252_v51 = vrot.slane %v2084_v46, 3  ;;  %v2779_v53 = vpop.f32.mrb[20].mxu0 }
 0x1de   :  { %v2780_v54 = vpop.f32.mrb[21].mxu0 }
 0x1df   :  { %v2781_v55 = vadd.f32 %v2780_v54, %v2779_v53  ;;  %v2782_v56 = vpop.f32.mrb[22].mxu0  ;;  %2259 = vrot.lane.b32.xlu1 %v2252_v51, %s3236_s1  ;;  %v2253_v57 = vsel %vm2250_vm2, %v2251_v50, %v2252_v51  ;;  %v2331_v50 = vld [vmem:[%s4325_s3 + $0x20] sm:$0xff]  ;;  %v2332_v51 = vld [vmem:[%s4325_s3 + $0x28] sm:$0xff] }
 0x1e0   :  { %v2783_v58 = vpop.f32.mrb[23].mxu0  ;;  %2257 = vrot.lane.b32.xlu0 %v2253_v57, %s3236_s1  ;;  %v2333_v57 = vld [vmem:[%s4325_s3 + $0x30] sm:$0xff] }
 0x1e1   :  { %v2089_v59 = vadd.f32 %v2781_v55, %v2040_v20  ;;  %v2784_v60 = vadd.f32 %v2783_v58, %v2782_v56  ;;  %v2792_v56 = vpack.c.bf16 %v2332_v51, %v2331_v50  ;;  %v2334_v58 = vld [vmem:[%s4325_s3 + $0x38] sm:$0xff] }
 0x1e3   :  { %v2092_v7 = vadd.f32 %v2784_v60, %v2043_v27  ;;  %v2254_v24 = vrot.slane %v2089_v59, 3  ;;  %v2795_v60 = vpack.c.bf16 %v2334_v58, %v2333_v57 }
 0x1e5   :  { %v2255_v12 = vrot.slane %v2092_v7, 3  ;;  %v2335_v7 = vld [vmem:[%s4325_s3 + $0x40] sm:$0xff] }
 0x1e7   :  { %2263 = vrot.lane.b32.xlu1 %v2255_v12, %s3236_s1  ;;  %v2256_v61 = vsel %vm2250_vm2, %v2254_v24, %v2255_v12  ;;  %v2336_v24 = vld [vmem:[%s4325_s3 + $0x48] sm:$0xff] }
 0x1e8   :  { %2261 = vrot.lane.b32.xlu0 %v2256_v61, %s3236_s1  ;;  %v2798_v12 = vpack.c.bf16 %v2336_v24, %v2335_v7  ;;  %v2337_v61 = vld [vmem:[%s4325_s3 + $0x50] sm:$0xff] }
 0x1eb   :  { %2108 = vrot.lane.b32.xlu1 %v2101_v13, %s3236_s1 }
 0x1ec   :  { %2106 = vrot.lane.b32.xlu0 %v4106_v22, %s3236_s1 }
 0x1ef   :  { %2112 = vrot.lane.b32.xlu1 %v2104_v41, %s3236_s1 }
 0x1f0   :  { %2110 = vrot.lane.b32.xlu0 %v4148_v48, %s3236_s1 }
 0x20d   :  { %v2219_v29 = vpop.permute.xlu0 %2218  ;;  %v2155_v19 = vpop.permute.xlu1 %2154 }
 0x20e   :  { %v2229_v23 = vadd.f32 %v2219_v29, %v4091_v9  ;;  %v2165_v62 = vadd.f32 %v2155_v19, %v4096_v15  ;;  %v2338_v29 = vld [vmem:[%s4325_s3 + $0x58] sm:$0xff] }
 0x20f   :  { %v2801_v19 = vpack.c.bf16 %v2338_v29, %v2337_v61 }
 0x210   :  { %v2184_v63 = vadd.f32 %v2174_v14, %v2165_v62  ;;  %v4189_v13 = vadd.f32 %v2233_v18, %v2229_v23  ;;  %v2339_v23 = vld [vmem:[%s4325_s3 + $0x60] sm:$0xff]  ;;  %v2340_v62 = vld [vmem:[%s4325_s3 + $0x68] sm:$0xff] }
 0x211   :  { %v2217_v22 = vpop.permute.xlu0 %2216 }
 0x212   :  { %v2228_v0 = vadd.f32 %v2217_v22, %v4083_v2  ;;  %v2189_v2 = vsel %vm2188_vm3, %v2184_v63, -inf  ;;  %v2804_v63 = vpack.c.bf16 %v2340_v62, %v2339_v23  ;;  %v2341_v22 = vld [vmem:[%s4325_s3 + $0x70] sm:$0xff] }
 0x214   :  { %v4193_v41 = vadd.f32 %v4120_v28, %v2228_v0  ;;  %v2342_v0 = vld [vmem:[%s4325_s3 + $0x78] sm:$0xff] }
 0x215   :  { %v2223_v48 = vpop.permute.xlu1 %2222  ;;  %v2153_v4 = vpop.permute.xlu0 %2152 }
 0x216   :  { %v2231_v5 = vadd.f32 %v2223_v48, %v4133_v38  ;;  %v2164_v6 = vadd.f32 %v2153_v4, %v4085_v3  ;;  %v2327_v38 = vld [vmem:[%s4325_s3] sm:$0xff]  ;;  %v2807_v48 = vpack.c.bf16 %v2342_v0, %v2341_v22 }
 0x217   :  { %v2343_v4 = vld [vmem:[%s4325_s3 + $0x80] sm:$0xff] }
 0x218   :  { %v2183_v9 = vadd.f32 %v4111_v25, %v2164_v6  ;;  %v4200_v14 = vadd.f32 %v2236_v47, %v2231_v5  ;;  %v2344_v5 = vld [vmem:[%s4325_s3 + $0x88] sm:$0xff] }
 0x219   :  { %v2159_v15 = vpop.permute.xlu1 %2158  ;;  %v2157_v16 = vpop.permute.xlu0 %2156  ;;  %v2810_v6 = vpack.c.bf16 %v2344_v5, %v2343_v4 }
 0x21a   :  { %v2187_v18 = vsel %vm2122_vm4, %v2183_v9, -inf  ;;  %v2167_v28 = vadd.f32 %v2159_v15, %v4138_v43  ;;  %v2166_v10 = vadd.f32 %v2157_v16, %v4126_v32  ;;  %v2345_v9 = vld [vmem:[%s4325_s3 + $0x90] sm:$0xff]  ;;  %v2346_v15 = vld [vmem:[%s4325_s3 + $0x98] sm:$0xff] }
 0x21b   :  { %v2190_v11 = vmax.f32 %v2187_v18, %v2189_v2  ;;  %v2813_v16 = vpack.c.bf16 %v2346_v15, %v2345_v9  ;;  %v2347_v2 = vld [vmem:[%s4325_s3 + $0xa0] sm:$0xff]  ;;  %v2348_v18 = vld [vmem:[%s4325_s3 + $0xa8] sm:$0xff] }
 0x21c   :  { %v2186_v3 = vadd.f32 %v2177_v42, %v2167_v28  ;;  %v2185_v17 = vadd.f32 %v4153_v49, %v2166_v10  ;;  %v2328_v42 = vld [vmem:[%s4325_s3 + $0x8] sm:$0xff]  ;;  %v2816_v28 = vpack.c.bf16 %v2348_v18, %v2347_v2 }
 0x21d   :  { %v2191_v25 = vrot.slane %v2190_v11, 4  ;;  %v2221_v20 = vpop.permute.xlu1 %2220 }
 0x21e   :  { %v2198_v34 = vsel %vm2188_vm3, %v2186_v3, -inf  ;;  %v2197_v47 = vsel %vm2122_vm4, %v2185_v17, -inf  ;;  %v2230_v21 = vadd.f32 %v2221_v20, %v4124_v31  ;;  %v2329_v31 = vld [vmem:[%s4325_s3 + $0x10] sm:$0xff] }
 0x21f   :  { %v2192_v26 = vmax.f32 %v2190_v11, %v2191_v25  ;;  %v2199_v27 = vmax.f32 %v2197_v47, %v2198_v34  ;;  %v2789_v46 = vpack.c.bf16 %v2330_v40, %v2329_v31 }
 0x220   :  { %v4211_v33 = vadd.f32 %v4162_v52, %v2230_v21  ;;  %v2786_v52 = vpack.c.bf16 %v2328_v42, %v2327_v38 }
 0x221   :  { %v2193_v43 = vrot.slane %v2192_v26, 2  ;;  %v2200_v32 = vrot.slane %v2199_v27, 4 }
 0x222   :  { %2787 = vmatpush1.bf16.msra.mxu1 %v2786_v52 }
 0x223   :  { %v2201_v35 = vmax.f32 %v2199_v27, %v2200_v32  ;;  %v2194_v36 = vmax.f32 %v2192_v26, %v2193_v43  ;;  %2788 = vmatprep.subr.bf16.mxu1 %v3237_v39 }
 0x225   :  { %v2202_v49 = vrot.slane %v2201_v35, 2  ;;  %v2195_v44 = vrot.slane %v2194_v36, 1 }
 0x226   :  { %2790 = vmatpush1.bf16.msra.mxu1 %v2789_v46 }
 0x227   :  { %v2203_v45 = vmax.f32 %v2201_v35, %v2202_v49  ;;  %v2196_v54 = vmax.f32 %v2194_v36, %v2195_v44  ;;  %2791 = vmatprep.subr.bf16.mxu1 %v3237_v39 }
 0x229   :  { %v2204_v53 = vrot.slane %v2203_v45, 1 }
 0x22a   :  { %2793 = vmatpush1.bf16.msra.mxu1 %v2792_v56 }
 0x22b   :  { %v2205_v55 = vmax.f32 %v2203_v45, %v2204_v53  ;;  %2794 = vmatprep.subr.bf16.mxu1 %v3237_v39 }
 0x22d   :  { %v2300_v59 = vsel %vm2295_vm5, %v2205_v55, %v2196_v54 }
 0x22e   :  { %2301 = vrot.lane.b32.xlu0 %v2300_v59, %s3236_s1  ;;  %2796 = vmatpush1.bf16.msra.mxu1 %v2795_v60 }
 0x22f   :  { %2797 = vmatprep.subr.bf16.mxu1 %v3237_v39 }
 0x232   :  { %2799 = vmatpush1.bf16.msra.mxu1 %v2798_v12 }
 0x233   :  { %2800 = vmatprep.subr.bf16.mxu1 %v3237_v39 }
 0x236   :  { %2802 = vmatpush1.bf16.msra.mxu1 %v2801_v19 }
 0x237   :  { %2803 = vmatprep.subr.bf16.mxu1 %v3237_v39 }
 0x23a   :  { %2805 = vmatpush1.bf16.msra.mxu1 %v2804_v63 }
 0x23b   :  { %2806 = vmatprep.subr.bf16.mxu1 %v3237_v39 }
 0x23e   :  { %2808 = vmatpush1.bf16.msra.mxu1 %v2807_v48 }
 0x23f   :  { %2809 = vmatprep.subr.bf16.mxu1 %v3237_v39 }
 0x242   :  { %2811 = vmatpush1.bf16.msra.mxu1 %v2810_v6  ;;  %v2313_v6 = vlaneseq }
 0x243   :  { %2812 = vmatprep.subr.bf16.mxu1 %v3237_v39 }
 0x244   :  { %v2314_v9 = vshrl.u32 %v2313_v6, 7 }
 0x246   :  { %2814 = vmatpush1.bf16.msra.mxu1 %v2813_v16  ;;  %v2315_v15 = vsub.s32 0, %v2314_v9  ;;  %v2311_v16 = vld [vmem:[%s4324_s2] sm:$0x3]  ;;  %v2319_v2 = vsub.s32 1, %v2314_v9  ;;  %s2439_s2 = sshll.u32 %s3238_s23, 4  ;;  %s2440_s2 = int_to_ptr.vmem [resolvable:$true] %s2439_s2 }
 0x247   :  { %2815 = vmatprep.subr.bf16.mxu1 %v3237_v39  ;;  %s3212_s24 = scalar_lea.vmem %s2440_s2, 32  ;;  %p3217_p1 = scmp.lt.s32.totalorder %s2440_s2, %s2440_s2 }
 0x248   :  { %p3213_p0 = scmp.ne.s32.totalorder %s2440_s2, %s3212_s24  ;;  %p3218_p2 = scmp.lt.s32.totalorder %s3212_s24, %s3212_s24 }
 0x24a   :  { %2817 = vmatpush1.bf16.msra.mxu1 %v2816_v28  ;;  %v2316_v28 = vrot.slane %v2311_v16, %v2315_v15  ;;  %p3219_p3 = por %p3218_p2, %p3217_p1 }
 0x24b   :  { %2818 = vmatprep.subr.bf16.mxu1 %v3237_v39  ;;  %v2349_v39 = vld [vmem:[%s4325_s3 + $0xb0] sm:$0xff] }
 0x24c   :  { %p3220_p4 = pnand %p3219_p3, %p3213_p0 }
 0x251   :  { %v2260_v10 = vpop.permute.xlu1 %2259 }
 0x252   :  { %v2270_v11 = vadd.f32 %v2260_v10, %v4189_v13  ;;  %v2258_v3 = vpop.permute.xlu0 %2257 }
 0x253   :  { %v2269_v17 = vadd.f32 %v2258_v3, %v4193_v41 }
 0x254   :  { %v2276_v25 = vsel %vm2275_vm6, %v2270_v11, -inf  ;;  %v2320_v11 = vrot.slane %v2311_v16, %v2319_v2 }
 0x255   :  { %v2274_v20 = vsel %vm2273_vm7, %v2269_v17, -inf }
 0x256   :  { %v2277_v34 = vmax.f32 %v2274_v20, %v2276_v25 }
 0x258   :  { %v2278_v47 = vrot.slane %v2277_v34, 4 }
 0x259   :  { %v2264_v21 = vpop.permute.xlu1 %2263 }
 0x25a   :  { %v2279_v26 = vmax.f32 %v2277_v34, %v2278_v47  ;;  %v2272_v27 = vadd.f32 %v2264_v21, %v4200_v14  ;;  %v2262_v43 = vpop.permute.xlu0 %2261  ;;  %v2350_v14 = vld [vmem:[%s4325_s3 + $0xb8] sm:$0xff]  ;;  %v2699_v47 = vld [vmem:[%s4326_s4] ss:$0 sm:$0xff] }
 0x25b   :  { %v2271_v32 = vadd.f32 %v2262_v43, %v4211_v33  ;;  %v2819_v40 = vpack.c.bf16 %v2350_v14, %v2349_v39 }
 0x25c   :  { %v2285_v35 = vsel %vm2275_vm6, %v2272_v27, -inf  ;;  %v2280_v13 = vrot.slane %v2279_v26, 2 }
 0x25d   :  { %v2284_v36 = vsel %vm2273_vm7, %v2271_v32, -inf  ;;  %v2109_v38 = vpop.permute.xlu1 %2108  ;;  %2820 = vmatpush1.bf16.msra.mxu1 %v2819_v40 }
 0x25e   :  { %v2286_v42 = vmax.f32 %v2284_v36, %v2285_v35  ;;  %v2119_v31 = vadd.f32 %v2109_v38, %v4089_v8  ;;  %v2107_v41 = vpop.permute.xlu0 %2106  ;;  %v2281_v46 = vmax.f32 %v2279_v26, %v2280_v13 }
 0x25f   :  { %v2118_v49 = vadd.f32 %v2107_v41, %v4081_v1 }
 0x260   :  { %v2287_v33 = vrot.slane %v2286_v42, 4  ;;  %v2125_v52 = vsel %vm2124_vm8, %v2119_v31, -inf  ;;  %v2282_v7 = vrot.slane %v2281_v46, 1 }
 0x261   :  { %v2123_v44 = vsel %vm2122_vm4, %v2118_v49, -inf  ;;  %v2113_v45 = vpop.permute.xlu1 %2112 }
 0x262   :  { %v2288_v8 = vmax.f32 %v2286_v42, %v2287_v33  ;;  %v2126_v50 = vmax.f32 %v2123_v44, %v2125_v52  ;;  %v2121_v1 = vadd.f32 %v2113_v45, %v4131_v37  ;;  %v2111_v51 = vpop.permute.xlu0 %2110  ;;  %v2283_v37 = vmax.f32 %v2281_v46, %v2282_v7 }
 0x263   :  { %v2120_v53 = vadd.f32 %v2111_v51, %v4122_v30 }
 0x264   :  { %v2289_v54 = vrot.slane %v2288_v8, 2  ;;  %v2127_v55 = vrot.slane %v2126_v50, 4  ;;  %v2134_v56 = vsel %vm2124_vm8, %v2121_v1, -inf }
 0x265   :  { %v2133_v57 = vsel %vm2122_vm4, %v2120_v53, -inf }
 0x266   :  { %v2290_v58 = vmax.f32 %v2288_v8, %v2289_v54  ;;  %v2128_v59 = vmax.f32 %v2126_v50, %v2127_v55  ;;  %v2135_v60 = vmax.f32 %v2133_v57, %v2134_v56 }
 0x268   :  { %v2129_v24 = vrot.slane %v2128_v59, 2  ;;  %v2136_v12 = vrot.slane %v2135_v60, 4  ;;  %v2291_v61 = vrot.slane %v2290_v58, 1 }
 0x26a   :  { %v2130_v29 = vmax.f32 %v2128_v59, %v2129_v24  ;;  %v2137_v19 = vmax.f32 %v2135_v60, %v2136_v12  ;;  %v2292_v23 = vmax.f32 %v2290_v58, %v2291_v61 }
 0x26c   :  { %v2138_v62 = vrot.slane %v2137_v19, 2  ;;  %v2306_v30 = vsel %vm2295_vm5, %v2292_v23, %v2283_v37  ;;  %v2131_v63 = vrot.slane %v2130_v29, 1 }
 0x26d   :  { %2307 = vrot.lane.b32.xlu1 %v2306_v30, %s3236_s1 }
 0x26e   :  { %v2139_v22 = vmax.f32 %v2137_v19, %v2138_v62  ;;  %v2132_v48 = vmax.f32 %v2130_v29, %v2131_v63 }
 0x270   :  { %v2140_v0 = vrot.slane %v2139_v22, 1 }
 0x272   :  { %v2141_v4 = vmax.f32 %v2139_v22, %v2140_v0 }
 0x274   :  { %v2296_v5 = vsel %vm2295_vm5, %v2141_v4, %v2132_v48 }
 0x2a0   :  { %v2302_v18 = vpop.permute.xlu0 %2301 }
 0x2a1   :  { %v2310_v10 = vsel %vm2122_vm4, %v2296_v5, %v2302_v18 }
 0x2a2   :  { %v2323_v3 = vadd.f32 %v2316_v28, %v2310_v10 }
 0x2a4   :  { %v2325_v34 = vmax.f32 %v2323_v3, 0.0 }
 0x2df   :  { %v2308_v17 = vpop.permute.xlu1 %2307 }
 0x2e0   :  { %v2324_v25 = vadd.f32 %v2320_v11, %v2308_v17 }
 0x2e2   :  { %v2326_v20 = vmax.f32 %v2324_v25, 0.0 }
 0x2e4   :  { %2700 = vmatprep.mubr.msk.f32.mxu1 %vm2122_vm4, %v2326_v20 }
 0x2e5   :  { %2426 = vmatmul.mubr.f32.vlgmr.msra.gmra.mrb[16].mxu1 %v2325_v34 }
 0x3b8   :  { %v2427_v21 = vpop.f32.mrb[16].mxu1 }
 0x3b9   :  { %v2428_v26 = vadd.f32 %v2699_v47, %v2427_v21  ;;  %v2429_v27 = vpop.f32.mrb[17].mxu1 }
 0x3bb   :  { %2432 = vst.msk [vmem:[#allocation2] sm:$0x3] %vm2431_vm9, %v2428_v26 }
 0x3bc   :  { %3223 = shalt.err (!%p3220_p4)
}
 0x3bd   :  { %s3224_s27 = scalar_lea.hbm %s4327_s5, 32 }
 0x3be   :  { %p3225_p5 = scmp.ne.s32.totalorder %s4327_s5, %s3224_s27  ;;  %p3228_p6 = scmp.lt.u32.totalorder %s3224_s27, %s4327_s5 }
 0x3c0   :  { %p3230_p7 = pnand %p3228_p6, %p3225_p5 }
 0x3c2   :  { %3233 = shalt.err (!%p3230_p7)
}
 0x3c3   :  { %2442 = dma.vmem_to_hbm [thread:$0]  %s2440_s2, 32, %s4327_s5, [#allocation3]  }
 0x3c4   :  { %3234 = dma.done.wait [#allocation3], 32  }
 0x3c5   :  { %3235 = vsyncadd [#allocation3], 4294967264 }
 0x3c6   :  { %2446 = vsyncpa [#allocation3], 1 }

</bundles_post_ra>
